<compile_context>
chip_gen: v7x
topology: tpu7x:2x2x1
jax: 0.10.0
libtpu: 0.0.40
codegen_flags: <defaults>
</compile_context>

<pallas_src>
import functools

import jax
import jax.numpy as jnp
from jax import lax
from jax.experimental import pallas as pl
from jax.experimental.pallas import tpu as pltpu


def _round_up(x, m):
    return ((x + m - 1) // m) * m


def _make_kernel(*, K, stride, BH, BR, Wp_pad, Wo, flat_alloc, Cinp, Coutp):
    """Kernel for one (image, row-block) grid step.

    Refs:
      x_hbm : (N, Hp*Wp_pad, Cinp) bf16 in HBM (memory_space=ANY, flat H*W)
      w_ref : (K, K, Cinp, Coutp)  bf16, BN scale folded in          (VMEM)
      b_ref : (1, Coutp)           f32 folded BN bias                (VMEM)
      o_ref : (1, BH, Wo, Coutp)   bf16 output row block             (VMEM)
      xbuf  : (2, flat_alloc, Cinp) bf16 double-buffered input slab  (scratch)
      sems  : DMA semaphores, one per slot                           (scratch)
    """
    n_chunks = BH // BR
    MC = BR * Wp_pad                      # MXU M per dot (whole rows)

    def kernel(x_hbm, w_ref, b_ref, o_ref, xbuf, sems):
        nb = pl.program_id(0)
        hb = pl.program_id(1)
        nhb = pl.num_programs(1)
        slot = hb % 2

        def issue(block_idx, to_slot):
            row0 = block_idx * (BH * stride) * Wp_pad
            pltpu.make_async_copy(
                x_hbm.at[nb, pl.ds(row0, flat_alloc), :],
                xbuf.at[to_slot],
                sems.at[to_slot]).start()

        # Prime the pipeline at the first row-block of each image.
        @pl.when(hb == 0)
        def _():
            issue(hb, slot)

        # Wait for the current block (issued above, or prefetched last step).
        row0 = hb * (BH * stride) * Wp_pad
        pltpu.make_async_copy(
            x_hbm.at[nb, pl.ds(row0, flat_alloc), :],
            xbuf.at[slot],
            sems.at[slot]).wait()

        # Prefetch the next row-block of this image into the other slot.
        @pl.when(hb + 1 < nhb)
        def _():
            issue(hb + 1, 1 - slot)

        bias = b_ref[...]                                  # (1, Coutp) f32

        # Flat-M convolution: output flat index m = r*Wp_pad + w maps to input
        # flat index stride*m + dy*Wp_pad + dx.  Columns w >= Wo are garbage
        # (computed from zero padding) and are simply never stored.
        for c in range(n_chunks):
            m0 = c * MC
            acc = None
            for dy in range(K):
                for dx in range(K):
                    start = stride * m0 + dy * Wp_pad + dx   # static
                    if stride == 1:
                        lhs = xbuf[slot, pl.ds(start, MC), :]
                    else:
                        lhs = xbuf[slot, pl.ds(start, MC, stride=stride), :]
                    part = jnp.dot(lhs, w_ref[dy, dx, :, :],
                                   preferred_element_type=jnp.float32)
                    acc = part if acc is None else acc + part
            y = acc + bias                                 # folded BN bias
            y = jnp.where(y >= 0.0, y, 0.1 * y)            # LeakyReLU(0.1)
            for rl in range(BR):
                r = c * BR + rl
                o_ref[0, r, :, :] = y[rl * Wp_pad:rl * Wp_pad + Wo, :].astype(
                    o_ref.dtype)

    return kernel


@functools.partial(jax.jit, static_argnames=("stride",))
def basic_conv_forward(x_nchw, params, *, stride=1):
    """BasicConv forward.  x: (N, Cin, H, W) f32 -> (N, Cout, Ho, Wo) bf16."""
    w_oihw = params["weight"]                 # (Cout, Cin, K, K) f32
    scale = params["bn_scale"]                # (Cout,) f32 = gamma/sqrt(var+eps)
    bias = params["bn_bias"]                  # (Cout,) f32 = beta - mean*scale

    cout, cin, k, _ = w_oihw.shape
    pad = k // 2
    n, _, h, w = x_nchw.shape
    ho = (h + 2 * pad - k) // stride + 1
    wo = (w + 2 * pad - k) // stride + 1

    cinp = _round_up(cin, 128)                # lane-dense contraction dim
    coutp = _round_up(cout, 128)              # lane-dense output stores

    # ---- row blocking / halo geometry (all static Python ints) -------------
    BH = ho if ho < 8 else 8                  # output rows per grid step
    nhb = -(-ho // BH)
    ho_p = nhb * BH                           # padded output rows
    bh_in = (BH - 1) * stride + k             # input rows actually needed

    wp = w + 2 * pad
    wp_pad = _round_up(wp, 8)                 # sublane-aligned row length

    # extra flat elements the garbage (w >= Wo) columns may read past bh_in
    extra_elems = max(0, (stride - 1) * wp_pad + k - stride)
    halo_rows = -(-extra_elems // wp_pad)
    bh_in_alloc = bh_in + halo_rows
    flat_alloc = bh_in_alloc * wp_pad         # flat elements DMA'd per step

    # rows of padded input so every block's DMA stays in bounds
    hp_nat = h + 2 * pad
    hp = max(hp_nat, (nhb - 1) * BH * stride + bh_in_alloc)

    # cap the live f32 accumulator at ~128 KiB (<= ~32 vregs)
    acc_cap = 128 * 1024
    BR = 1
    for cand in range(BH, 0, -1):
        if BH % cand == 0 and cand * wp_pad * coutp * 4 <= acc_cap:
            BR = cand
            break

    # ---- XLA glue -----------------------------------------------------------
    # bf16 first (halves transpose traffic), NCHW -> NHWC, zero-pad H/W/Cin,
    # then flatten (H, W) so the kernel can DMA haloed row-blocks as one slab.
    xb = x_nchw.astype(jnp.bfloat16)
    xb = jnp.transpose(xb, (0, 2, 3, 1))      # (N, H, W, Cin)
    xb = jnp.pad(xb, ((0, 0),
                      (pad, hp - h - pad),
                      (pad, wp_pad - w - pad),
                      (0, cinp - cin)))
    x_flat = xb.reshape(n, hp * wp_pad, cinp)

    # Fold BN scale into the conv weight (bf16); bias stays f32.
    w_k = jnp.transpose(w_oihw, (2, 3, 1, 0)) * scale[None, None, None, :]
    w_k = jnp.pad(w_k, ((0, 0), (0, 0),
                        (0, cinp - cin), (0, coutp - cout))).astype(jnp.bfloat16)
    b_k = jnp.pad(bias, (0, coutp - cout)).reshape(1, coutp).astype(jnp.float32)

    kernel = _make_kernel(K=k, stride=stride, BH=BH, BR=BR, Wp_pad=wp_pad,
                          Wo=wo, flat_alloc=flat_alloc, Cinp=cinp, Coutp=coutp)

    out = pl.pallas_call(
        kernel,
        out_shape=jax.ShapeDtypeStruct((n, ho_p, wo, coutp), jnp.bfloat16),
        grid=(n, nhb),
        in_specs=[
            pl.BlockSpec(memory_space=pl.ANY),                       # x (HBM)
            pl.BlockSpec((k, k, cinp, coutp), lambda nn, hh: (0, 0, 0, 0)),
            pl.BlockSpec((1, coutp), lambda nn, hh: (0, 0)),
        ],
        out_specs=pl.BlockSpec((1, BH, wo, coutp), lambda nn, hh: (nn, hh, 0, 0)),
        scratch_shapes=[
            pltpu.VMEM((2, flat_alloc, cinp), jnp.bfloat16),
            pltpu.SemaphoreType.DMA((2,)),
        ],
        compiler_params=pltpu.CompilerParams(
            dimension_semantics=("parallel", "arbitrary"),
            vmem_limit_bytes=48 * 1024 * 1024),
    )(x_flat, w_k, b_k)

    out = out[:, :ho, :, :cout]               # drop padded rows / channels
    # NHWC -> NCHW (in a fused network keep NHWC/bf16 and drop both transposes)
    return jnp.transpose(out, (0, 3, 1, 2))


# ----------------------------------------------------------------------------
# Deterministic synthetic parameters (BatchNorm folded, inference form).
# ----------------------------------------------------------------------------
def make_basic_conv_params(key, in_channels, out_channels, kernel_size,
                           eps=1e-5):
    k_w, k_g, k_b, k_m, k_v = jax.random.split(key, 5)
    fan_in = in_channels * kernel_size * kernel_size
    weight = jax.random.normal(
        k_w, (out_channels, in_channels, kernel_size, kernel_size),
        jnp.float32) * (1.0 / jnp.sqrt(fan_in))
    gamma = 1.0 + 0.1 * jax.random.normal(k_g, (out_channels,), jnp.float32)
    beta = 0.1 * jax.random.normal(k_b, (out_channels,), jnp.float32)
    mean = 0.1 * jax.random.normal(k_m, (out_channels,), jnp.float32)
    var = jnp.abs(1.0 + 0.1 * jax.random.normal(k_v, (out_channels,),
                                                jnp.float32))
    scale = gamma / jnp.sqrt(var + eps)
    bias = beta - mean * scale
    return {"weight": weight, "bn_scale": scale, "bn_bias": bias}


# ----------------------------------------------------------------------------
# Reference with the same numerics model as the kernel (bf16 inputs / folded
# bf16 weights, f32 accumulation) so the tolerance can be tight.
# ----------------------------------------------------------------------------
def reference_forward(x_nchw, params, *, stride=1):
    w = params["weight"]
    k = w.shape[-1]
    w_f = (w * params["bn_scale"][:, None, None, None]
           ).astype(jnp.bfloat16).astype(jnp.float32)
    x_f = x_nchw.astype(jnp.bfloat16).astype(jnp.float32)
    y = lax.conv_general_dilated(
        x_f, w_f, window_strides=(stride, stride),
        padding=[(k // 2, k // 2), (k // 2, k // 2)],
        dimension_numbers=("NCHW", "OIHW", "NCHW"),
        precision=lax.Precision.HIGHEST)
    y = y + params["bn_bias"][None, :, None, None]
    return jnp.where(y >= 0.0, y, 0.1 * y)


def _run_and_check(x, params, stride, name):
    y = jax.block_until_ready(basic_conv_forward(x, params, stride=stride))
    n, _, h, w = x.shape
    cout, _, k, _ = params["weight"].shape
    ho = (h + 2 * (k // 2) - k) // stride + 1
    wo = (w + 2 * (k // 2) - k) // stride + 1
    assert y.shape == (n, cout, ho, wo), (name, y.shape)
    yf = y.astype(jnp.float32)
    assert bool(jnp.all(jnp.isfinite(yf))), name
    ref = reference_forward(x, params, stride=stride)
    err = float(jnp.max(jnp.abs(yf - ref)))
    assert err < 4e-2, f"{name}: max abs err {err}"


if __name__ == "__main__":
    key = jax.random.PRNGKey(0)
    k_x, k_x2, k_p3, k_p1, k_ps2 = jax.random.split(key, 5)

    N, Cin, H, W, Cout = 2, 4, 16, 16, 8
    x = jax.random.normal(k_x, (N, Cin, H, W), jnp.float32)

    # 3x3 stride 1 (the common yolov4-tiny configuration)
    p3 = make_basic_conv_params(k_p3, Cin, Cout, 3)
    _run_and_check(x, p3, 1, "3x3 s1")

    # 3x3 stride 2 (downsampling convs) -- exercises the strided-load path
    ps2 = make_basic_conv_params(k_ps2, Cin, Cout, 3)
    _run_and_check(x, ps2, 2, "3x3 s2")

    # 1x1 stride 1
    p1 = make_basic_conv_params(k_p1, Cin, Cout, 1)
    _run_and_check(x, p1, 1, "1x1 s1")

    # odd spatial size -- exercises W-pad-to-8 and padded output rows
    x_odd = jax.random.normal(k_x2, (N, Cin, 10, 10), jnp.float32)
    _run_and_check(x_odd, p3, 1, "3x3 s1 odd")

    print("KERNEL_OK")
</pallas_src>

<mosaic_0001>
module attributes {stable_mosaic.version = 11 : i64} {
  func.func @kernel(%arg0: i32, %arg1: i32, %arg2: memref<2x456x128xbf16, #tpu.memory_space<any>>, %arg3: memref<3x3x128x128xbf16, #tpu.memory_space<vmem>>, %arg4: memref<1x128xf32, #tpu.memory_space<vmem>>, %arg5: memref<1x8x16x128xbf16, #tpu.memory_space<vmem>>, %arg6: memref<2x264x128xbf16, #tpu.memory_space<vmem>>, %arg7: memref<2x!tpu.dma_semaphore, #tpu.memory_space<semaphore_mem>>) attributes {dimension_semantics = [#tpu.dimension_semantics<parallel>, #tpu.dimension_semantics<arbitrary>], iteration_bounds = array<i64: 2, 2>, scalar_prefetch = 0 : i64, scratch_operands = 2 : i64, tpu.core_type = #tpu.core_type<tc>, window_params = [{}, {pipeline_mode = #tpu.pipeline_mode<synchronous>, transform_indices = @transform_1, window_bounds = array<i64: 3, 3, 128, 128>}, {pipeline_mode = #tpu.pipeline_mode<synchronous>, transform_indices = @transform_2, window_bounds = array<i64: 1, 128>}, {transform_indices = @transform_3, window_bounds = array<i64: 1, 8, 16, 128>}]} {
    %c2_i32 = arith.constant 2 : i32
    %c0_i32 = arith.constant 0 : i32
    %0 = arith.cmpi eq, %c2_i32, %c0_i32 : i32
    %c1_i32 = arith.constant 1 : i32
    %1 = arith.select %0, %c1_i32, %c2_i32 : i32
    %2 = arith.remsi %arg1, %1 : i32
    %c0_i32_0 = arith.constant 0 : i32
    %3 = arith.cmpi ne, %2, %c0_i32_0 : i32
    %c0_i32_1 = arith.constant 0 : i32
    %4 = arith.cmpi slt, %2, %c0_i32_1 : i32
    %c0_i32_2 = arith.constant 0 : i32
    %5 = arith.cmpi slt, %1, %c0_i32_2 : i32
    %6 = arith.xori %4, %5 : i1
    %7 = arith.andi %6, %3 : i1
    %8 = arith.addi %2, %1 : i32
    %9 = arith.select %7, %8, %2 : i32
    %c0_i32_3 = arith.constant 0 : i32
    %10 = arith.cmpi eq, %arg1, %c0_i32_3 : i32
    %11 = arith.extui %10 : i1 to i32
    %c0_i32_4 = arith.constant 0 : i32
    %12 = arith.cmpi ne, %11, %c0_i32_4 : i32
    scf.if %12 {
      %c8_i32_95 = arith.constant 8 : i32
      %135 = arith.muli %arg1, %c8_i32_95 : i32
      %c24_i32_96 = arith.constant 24 : i32
      %136 = arith.muli %135, %c24_i32_96 : i32
      %c0_i32_97 = arith.constant 0 : i32
      %137 = tpu.memref_slice %arg2[%arg0, %136, %c0_i32_97] : memref<2x456x128xbf16, #tpu.memory_space<any>> -> memref<1x264x128xbf16, #tpu.memory_space<any>>
      %138 = tpu.memref_squeeze %137 : memref<1x264x128xbf16, #tpu.memory_space<any>> -> memref<264x128xbf16, #tpu.memory_space<any>>
      %c0_i32_98 = arith.constant 0 : i32
      %c0_i32_99 = arith.constant 0 : i32
      %139 = tpu.memref_slice %arg6[%9, %c0_i32_98, %c0_i32_99] : memref<2x264x128xbf16, #tpu.memory_space<vmem>> -> memref<1x264x128xbf16, #tpu.memory_space<vmem>>
      %140 = tpu.memref_squeeze %139 : memref<1x264x128xbf16, #tpu.memory_space<vmem>> -> memref<264x128xbf16, #tpu.memory_space<vmem>>
      %141 = tpu.memref_slice %arg7[%9] : memref<2x!tpu.dma_semaphore, #tpu.memory_space<semaphore_mem>> -> memref<1x!tpu.dma_semaphore, #tpu.memory_space<semaphore_mem>>
      %142 = tpu.memref_squeeze %141 : memref<1x!tpu.dma_semaphore, #tpu.memory_space<semaphore_mem>> -> memref<!tpu.dma_semaphore, #tpu.memory_space<semaphore_mem>>
      tpu.enqueue_dma source(%138 : memref<264x128xbf16, #tpu.memory_space<any>>) target(%140 : memref<264x128xbf16, #tpu.memory_space<vmem>>) target_semaphore(%142 : memref<!tpu.dma_semaphore, #tpu.memory_space<semaphore_mem>>)
    } else {
    }
    %c8_i32 = arith.constant 8 : i32
    %13 = arith.muli %arg1, %c8_i32 : i32
    %c24_i32 = arith.constant 24 : i32
    %14 = arith.muli %13, %c24_i32 : i32
    %c0_i32_5 = arith.constant 0 : i32
    %15 = tpu.memref_slice %arg2[%arg0, %14, %c0_i32_5] : memref<2x456x128xbf16, #tpu.memory_space<any>> -> memref<1x264x128xbf16, #tpu.memory_space<any>>
    %16 = tpu.memref_squeeze %15 : memref<1x264x128xbf16, #tpu.memory_space<any>> -> memref<264x128xbf16, #tpu.memory_space<any>>
    %c0_i32_6 = arith.constant 0 : i32
    %c0_i32_7 = arith.constant 0 : i32
    %17 = tpu.memref_slice %arg6[%9, %c0_i32_6, %c0_i32_7] : memref<2x264x128xbf16, #tpu.memory_space<vmem>> -> memref<1x264x128xbf16, #tpu.memory_space<vmem>>
    %18 = tpu.memref_squeeze %17 : memref<1x264x128xbf16, #tpu.memory_space<vmem>> -> memref<264x128xbf16, #tpu.memory_space<vmem>>
    %19 = tpu.memref_slice %arg7[%9] : memref<2x!tpu.dma_semaphore, #tpu.memory_space<semaphore_mem>> -> memref<1x!tpu.dma_semaphore, #tpu.memory_space<semaphore_mem>>
    %20 = tpu.memref_squeeze %19 : memref<1x!tpu.dma_semaphore, #tpu.memory_space<semaphore_mem>> -> memref<!tpu.dma_semaphore, #tpu.memory_space<semaphore_mem>>
    tpu.wait_dma2 semaphore(%20 : memref<!tpu.dma_semaphore, #tpu.memory_space<semaphore_mem>>) src(%16 : memref<264x128xbf16, #tpu.memory_space<any>>) dst(%18 : memref<264x128xbf16, #tpu.memory_space<vmem>>)
    %c1_i32_8 = arith.constant 1 : i32
    %21 = arith.addi %arg1, %c1_i32_8 : i32
    %c2_i32_9 = arith.constant 2 : i32
    %22 = arith.cmpi slt, %21, %c2_i32_9 : i32
    %23 = arith.extui %22 : i1 to i32
    %c0_i32_10 = arith.constant 0 : i32
    %24 = arith.cmpi ne, %23, %c0_i32_10 : i32
    scf.if %24 {
      %c1_i32_95 = arith.constant 1 : i32
      %135 = arith.addi %arg1, %c1_i32_95 : i32
      %c1_i32_96 = arith.constant 1 : i32
      %136 = arith.subi %c1_i32_96, %9 : i32
      %c8_i32_97 = arith.constant 8 : i32
      %137 = arith.muli %135, %c8_i32_97 : i32
      %c24_i32_98 = arith.constant 24 : i32
      %138 = arith.muli %137, %c24_i32_98 : i32
      %c0_i32_99 = arith.constant 0 : i32
      %139 = tpu.memref_slice %arg2[%arg0, %138, %c0_i32_99] : memref<2x456x128xbf16, #tpu.memory_space<any>> -> memref<1x264x128xbf16, #tpu.memory_space<any>>
      %140 = tpu.memref_squeeze %139 : memref<1x264x128xbf16, #tpu.memory_space<any>> -> memref<264x128xbf16, #tpu.memory_space<any>>
      %c0_i32_100 = arith.constant 0 : i32
      %c0_i32_101 = arith.constant 0 : i32
      %141 = tpu.memref_slice %arg6[%136, %c0_i32_100, %c0_i32_101] : memref<2x264x128xbf16, #tpu.memory_space<vmem>> -> memref<1x264x128xbf16, #tpu.memory_space<vmem>>
      %142 = tpu.memref_squeeze %141 : memref<1x264x128xbf16, #tpu.memory_space<vmem>> -> memref<264x128xbf16, #tpu.memory_space<vmem>>
      %143 = tpu.memref_slice %arg7[%136] : memref<2x!tpu.dma_semaphore, #tpu.memory_space<semaphore_mem>> -> memref<1x!tpu.dma_semaphore, #tpu.memory_space<semaphore_mem>>
      %144 = tpu.memref_squeeze %143 : memref<1x!tpu.dma_semaphore, #tpu.memory_space<semaphore_mem>> -> memref<!tpu.dma_semaphore, #tpu.memory_space<semaphore_mem>>
      tpu.enqueue_dma source(%140 : memref<264x128xbf16, #tpu.memory_space<any>>) target(%142 : memref<264x128xbf16, #tpu.memory_space<vmem>>) target_semaphore(%144 : memref<!tpu.dma_semaphore, #tpu.memory_space<semaphore_mem>>)
    } else {
    }
    %c0 = arith.constant 0 : index
    %c0_11 = arith.constant 0 : index
    %25 = vector.load %arg4[%c0, %c0_11] : memref<1x128xf32, #tpu.memory_space<vmem>>, vector<1x128xf32>
    %26 = arith.index_cast %9 : i32 to index
    %c0_12 = arith.constant 0 : index
    %c0_13 = arith.constant 0 : index
    %27 = vector.load %arg6[%26, %c0_12, %c0_13] : memref<2x264x128xbf16, #tpu.memory_space<vmem>>, vector<1x192x128xbf16>
    %28 = vector.shape_cast %27 : vector<1x192x128xbf16> to vector<192x128xbf16>
    %c0_14 = arith.constant 0 : index
    %c0_15 = arith.constant 0 : index
    %c0_16 = arith.constant 0 : index
    %c0_17 = arith.constant 0 : index
    %29 = vector.load %arg3[%c0_14, %c0_15, %c0_16, %c0_17] : memref<3x3x128x128xbf16, #tpu.memory_space<vmem>>, vector<1x1x128x128xbf16>
    %30 = vector.shape_cast %29 : vector<1x1x128x128xbf16> to vector<128x128xbf16>
    %cst = arith.constant dense<0.000000e+00> : vector<192x128xf32>
    %31 = tpu.matmul %28, %30, %cst {dimension_numbers = #tpu.dot_dimension_numbers<[1], [0], [0], [1], [0, 0, 1, 1], [], []>} : vector<192x128xbf16>, vector<128x128xbf16>, vector<192x128xf32> -> vector<192x128xf32>
    %32 = arith.index_cast %9 : i32 to index
    %c1 = arith.constant 1 : index
    %c0_18 = arith.constant 0 : index
    %33 = vector.load %arg6[%32, %c1, %c0_18] : memref<2x264x128xbf16, #tpu.memory_space<vmem>>, vector<1x192x128xbf16>
    %34 = vector.shape_cast %33 : vector<1x192x128xbf16> to vector<192x128xbf16>
    %c0_19 = arith.constant 0 : index
    %c1_20 = arith.constant 1 : index
    %c0_21 = arith.constant 0 : index
    %c0_22 = arith.constant 0 : index
    %35 = vector.load %arg3[%c0_19, %c1_20, %c0_21, %c0_22] : memref<3x3x128x128xbf16, #tpu.memory_space<vmem>>, vector<1x1x128x128xbf16>
    %36 = vector.shape_cast %35 : vector<1x1x128x128xbf16> to vector<128x128xbf16>
    %cst_23 = arith.constant dense<0.000000e+00> : vector<192x128xf32>
    %37 = tpu.matmul %34, %36, %cst_23 {dimension_numbers = #tpu.dot_dimension_numbers<[1], [0], [0], [1], [0, 0, 1, 1], [], []>} : vector<192x128xbf16>, vector<128x128xbf16>, vector<192x128xf32> -> vector<192x128xf32>
    %38 = arith.addf %31, %37 : vector<192x128xf32>
    %39 = arith.index_cast %9 : i32 to index
    %c2 = arith.constant 2 : index
    %c0_24 = arith.constant 0 : index
    %40 = vector.load %arg6[%39, %c2, %c0_24] : memref<2x264x128xbf16, #tpu.memory_space<vmem>>, vector<1x192x128xbf16>
    %41 = vector.shape_cast %40 : vector<1x192x128xbf16> to vector<192x128xbf16>
    %c0_25 = arith.constant 0 : index
    %c2_26 = arith.constant 2 : index
    %c0_27 = arith.constant 0 : index
    %c0_28 = arith.constant 0 : index
    %42 = vector.load %arg3[%c0_25, %c2_26, %c0_27, %c0_28] : memref<3x3x128x128xbf16, #tpu.memory_space<vmem>>, vector<1x1x128x128xbf16>
    %43 = vector.shape_cast %42 : vector<1x1x128x128xbf16> to vector<128x128xbf16>
    %cst_29 = arith.constant dense<0.000000e+00> : vector<192x128xf32>
    %44 = tpu.matmul %41, %43, %cst_29 {dimension_numbers = #tpu.dot_dimension_numbers<[1], [0], [0], [1], [0, 0, 1, 1], [], []>} : vector<192x128xbf16>, vector<128x128xbf16>, vector<192x128xf32> -> vector<192x128xf32>
    %45 = arith.addf %38, %44 : vector<192x128xf32>
    %46 = arith.index_cast %9 : i32 to index
    %c24 = arith.constant 24 : index
    %c0_30 = arith.constant 0 : index
    %47 = vector.load %arg6[%46, %c24, %c0_30] : memref<2x264x128xbf16, #tpu.memory_space<vmem>>, vector<1x192x128xbf16>
    %48 = vector.shape_cast %47 : vector<1x192x128xbf16> to vector<192x128xbf16>
    %c1_31 = arith.constant 1 : index
    %c0_32 = arith.constant 0 : index
    %c0_33 = arith.constant 0 : index
    %c0_34 = arith.constant 0 : index
    %49 = vector.load %arg3[%c1_31, %c0_32, %c0_33, %c0_34] : memref<3x3x128x128xbf16, #tpu.memory_space<vmem>>, vector<1x1x128x128xbf16>
    %50 = vector.shape_cast %49 : vector<1x1x128x128xbf16> to vector<128x128xbf16>
    %cst_35 = arith.constant dense<0.000000e+00> : vector<192x128xf32>
    %51 = tpu.matmul %48, %50, %cst_35 {dimension_numbers = #tpu.dot_dimension_numbers<[1], [0], [0], [1], [0, 0, 1, 1], [], []>} : vector<192x128xbf16>, vector<128x128xbf16>, vector<192x128xf32> -> vector<192x128xf32>
    %52 = arith.addf %45, %51 : vector<192x128xf32>
    %53 = arith.index_cast %9 : i32 to index
    %c25 = arith.constant 25 : index
    %c0_36 = arith.constant 0 : index
    %54 = vector.load %arg6[%53, %c25, %c0_36] : memref<2x264x128xbf16, #tpu.memory_space<vmem>>, vector<1x192x128xbf16>
    %55 = vector.shape_cast %54 : vector<1x192x128xbf16> to vector<192x128xbf16>
    %c1_37 = arith.constant 1 : index
    %c1_38 = arith.constant 1 : index
    %c0_39 = arith.constant 0 : index
    %c0_40 = arith.constant 0 : index
    %56 = vector.load %arg3[%c1_37, %c1_38, %c0_39, %c0_40] : memref<3x3x128x128xbf16, #tpu.memory_space<vmem>>, vector<1x1x128x128xbf16>
    %57 = vector.shape_cast %56 : vector<1x1x128x128xbf16> to vector<128x128xbf16>
    %cst_41 = arith.constant dense<0.000000e+00> : vector<192x128xf32>
    %58 = tpu.matmul %55, %57, %cst_41 {dimension_numbers = #tpu.dot_dimension_numbers<[1], [0], [0], [1], [0, 0, 1, 1], [], []>} : vector<192x128xbf16>, vector<128x128xbf16>, vector<192x128xf32> -> vector<192x128xf32>
    %59 = arith.addf %52, %58 : vector<192x128xf32>
    %60 = arith.index_cast %9 : i32 to index
    %c26 = arith.constant 26 : index
    %c0_42 = arith.constant 0 : index
    %61 = vector.load %arg6[%60, %c26, %c0_42] : memref<2x264x128xbf16, #tpu.memory_space<vmem>>, vector<1x192x128xbf16>
    %62 = vector.shape_cast %61 : vector<1x192x128xbf16> to vector<192x128xbf16>
    %c1_43 = arith.constant 1 : index
    %c2_44 = arith.constant 2 : index
    %c0_45 = arith.constant 0 : index
    %c0_46 = arith.constant 0 : index
    %63 = vector.load %arg3[%c1_43, %c2_44, %c0_45, %c0_46] : memref<3x3x128x128xbf16, #tpu.memory_space<vmem>>, vector<1x1x128x128xbf16>
    %64 = vector.shape_cast %63 : vector<1x1x128x128xbf16> to vector<128x128xbf16>
    %cst_47 = arith.constant dense<0.000000e+00> : vector<192x128xf32>
    %65 = tpu.matmul %62, %64, %cst_47 {dimension_numbers = #tpu.dot_dimension_numbers<[1], [0], [0], [1], [0, 0, 1, 1], [], []>} : vector<192x128xbf16>, vector<128x128xbf16>, vector<192x128xf32> -> vector<192x128xf32>
    %66 = arith.addf %59, %65 : vector<192x128xf32>
    %67 = arith.index_cast %9 : i32 to index
    %c48 = arith.constant 48 : index
    %c0_48 = arith.constant 0 : index
    %68 = vector.load %arg6[%67, %c48, %c0_48] : memref<2x264x128xbf16, #tpu.memory_space<vmem>>, vector<1x192x128xbf16>
    %69 = vector.shape_cast %68 : vector<1x192x128xbf16> to vector<192x128xbf16>
    %c2_49 = arith.constant 2 : index
    %c0_50 = arith.constant 0 : index
    %c0_51 = arith.constant 0 : index
    %c0_52 = arith.constant 0 : index
    %70 = vector.load %arg3[%c2_49, %c0_50, %c0_51, %c0_52] : memref<3x3x128x128xbf16, #tpu.memory_space<vmem>>, vector<1x1x128x128xbf16>
    %71 = vector.shape_cast %70 : vector<1x1x128x128xbf16> to vector<128x128xbf16>
    %cst_53 = arith.constant dense<0.000000e+00> : vector<192x128xf32>
    %72 = tpu.matmul %69, %71, %cst_53 {dimension_numbers = #tpu.dot_dimension_numbers<[1], [0], [0], [1], [0, 0, 1, 1], [], []>} : vector<192x128xbf16>, vector<128x128xbf16>, vector<192x128xf32> -> vector<192x128xf32>
    %73 = arith.addf %66, %72 : vector<192x128xf32>
    %74 = arith.index_cast %9 : i32 to index
    %c49 = arith.constant 49 : index
    %c0_54 = arith.constant 0 : index
    %75 = vector.load %arg6[%74, %c49, %c0_54] : memref<2x264x128xbf16, #tpu.memory_space<vmem>>, vector<1x192x128xbf16>
    %76 = vector.shape_cast %75 : vector<1x192x128xbf16> to vector<192x128xbf16>
    %c2_55 = arith.constant 2 : index
    %c1_56 = arith.constant 1 : index
    %c0_57 = arith.constant 0 : index
    %c0_58 = arith.constant 0 : index
    %77 = vector.load %arg3[%c2_55, %c1_56, %c0_57, %c0_58] : memref<3x3x128x128xbf16, #tpu.memory_space<vmem>>, vector<1x1x128x128xbf16>
    %78 = vector.shape_cast %77 : vector<1x1x128x128xbf16> to vector<128x128xbf16>
    %cst_59 = arith.constant dense<0.000000e+00> : vector<192x128xf32>
    %79 = tpu.matmul %76, %78, %cst_59 {dimension_numbers = #tpu.dot_dimension_numbers<[1], [0], [0], [1], [0, 0, 1, 1], [], []>} : vector<192x128xbf16>, vector<128x128xbf16>, vector<192x128xf32> -> vector<192x128xf32>
    %80 = arith.addf %73, %79 : vector<192x128xf32>
    %81 = arith.index_cast %9 : i32 to index
    %c50 = arith.constant 50 : index
    %c0_60 = arith.constant 0 : index
    %82 = vector.load %arg6[%81, %c50, %c0_60] : memref<2x264x128xbf16, #tpu.memory_space<vmem>>, vector<1x192x128xbf16>
    %83 = vector.shape_cast %82 : vector<1x192x128xbf16> to vector<192x128xbf16>
    %c2_61 = arith.constant 2 : index
    %c2_62 = arith.constant 2 : index
    %c0_63 = arith.constant 0 : index
    %c0_64 = arith.constant 0 : index
    %84 = vector.load %arg3[%c2_61, %c2_62, %c0_63, %c0_64] : memref<3x3x128x128xbf16, #tpu.memory_space<vmem>>, vector<1x1x128x128xbf16>
    %85 = vector.shape_cast %84 : vector<1x1x128x128xbf16> to vector<128x128xbf16>
    %cst_65 = arith.constant dense<0.000000e+00> : vector<192x128xf32>
    %86 = tpu.matmul %83, %85, %cst_65 {dimension_numbers = #tpu.dot_dimension_numbers<[1], [0], [0], [1], [0, 0, 1, 1], [], []>} : vector<192x128xbf16>, vector<128x128xbf16>, vector<192x128xf32> -> vector<192x128xf32>
    %87 = arith.addf %80, %86 : vector<192x128xf32>
    %88 = vector.broadcast %25 : vector<1x128xf32> to vector<192x128xf32>
    %89 = arith.addf %87, %88 : vector<192x128xf32>
    %cst_66 = arith.constant 0.000000e+00 : f32
    %90 = vector.broadcast %cst_66 : f32 to vector<192x128xf32>
    %91 = arith.cmpf oge, %89, %90 : vector<192x128xf32>
    %cst_67 = arith.constant 1.000000e-01 : f32
    %92 = vector.broadcast %cst_67 : f32 to vector<192x128xf32>
    %93 = arith.mulf %92, %89 : vector<192x128xf32>
    %94 = arith.select %91, %89, %93 : vector<192x128xi1>, vector<192x128xf32>
    %95 = vector.extract_strided_slice %94 {offsets = [0, 0], sizes = [16, 128], strides = [1, 1]} : vector<192x128xf32> to vector<16x128xf32>
    %96 = arith.truncf %95 : vector<16x128xf32> to vector<16x128xbf16>
    %c0_68 = arith.constant 0 : index
    %c0_69 = arith.constant 0 : index
    %c0_70 = arith.constant 0 : index
    %c0_71 = arith.constant 0 : index
    %97 = vector.load %arg5[%c0_68, %c0_69, %c0_70, %c0_71] : memref<1x8x16x128xbf16, #tpu.memory_space<vmem>>, vector<1x1x16x128xbf16>
    %98 = vector.shape_cast %97 : vector<1x1x16x128xbf16> to vector<16x128xbf16>
    %99 = vector.shape_cast %96 : vector<16x128xbf16> to vector<1x1x16x128xbf16>
    tpu.vector_store %arg5[%c0_68, %c0_69, %c0_70, %c0_71], %99 {strides = array<i32>} : memref<1x8x16x128xbf16, #tpu.memory_space<vmem>>, vector<1x1x16x128xbf16>,
    %100 = vector.extract_strided_slice %94 {offsets = [24, 0], sizes = [16, 128], strides = [1, 1]} : vector<192x128xf32> to vector<16x128xf32>
    %101 = arith.truncf %100 : vector<16x128xf32> to vector<16x128xbf16>
    %c0_72 = arith.constant 0 : index
    %c1_73 = arith.constant 1 : index
    %c0_74 = arith.constant 0 : index
    %c0_75 = arith.constant 0 : index
    %102 = vector.load %arg5[%c0_72, %c1_73, %c0_74, %c0_75] : memref<1x8x16x128xbf16, #tpu.memory_space<vmem>>, vector<1x1x16x128xbf16>
    %103 = vector.shape_cast %102 : vector<1x1x16x128xbf16> to vector<16x128xbf16>
    %104 = vector.shape_cast %101 : vector<16x128xbf16> to vector<1x1x16x128xbf16>
    tpu.vector_store %arg5[%c0_72, %c1_73, %c0_74, %c0_75], %104 {strides = array<i32>} : memref<1x8x16x128xbf16, #tpu.memory_space<vmem>>, vector<1x1x16x128xbf16>,
    %105 = vector.extract_strided_slice %94 {offsets = [48, 0], sizes = [16, 128], strides = [1, 1]} : vector<192x128xf32> to vector<16x128xf32>
    %106 = arith.truncf %105 : vector<16x128xf32> to vector<16x128xbf16>
    %c0_76 = arith.constant 0 : index
    %c2_77 = arith.constant 2 : index
    %c0_78 = arith.constant 0 : index
    %c0_79 = arith.constant 0 : index
    %107 = vector.load %arg5[%c0_76, %c2_77, %c0_78, %c0_79] : memref<1x8x16x128xbf16, #tpu.memory_space<vmem>>, vector<1x1x16x128xbf16>
    %108 = vector.shape_cast %107 : vector<1x1x16x128xbf16> to vector<16x128xbf16>
    %109 = vector.shape_cast %106 : vector<16x128xbf16> to vector<1x1x16x128xbf16>
    tpu.vector_store %arg5[%c0_76, %c2_77, %c0_78, %c0_79], %109 {strides = array<i32>} : memref<1x8x16x128xbf16, #tpu.memory_space<vmem>>, vector<1x1x16x128xbf16>,
    %110 = vector.extract_strided_slice %94 {offsets = [72, 0], sizes = [16, 128], strides = [1, 1]} : vector<192x128xf32> to vector<16x128xf32>
    %111 = arith.truncf %110 : vector<16x128xf32> to vector<16x128xbf16>
    %c0_80 = arith.constant 0 : index
    %c3 = arith.constant 3 : index
    %c0_81 = arith.constant 0 : index
    %c0_82 = arith.constant 0 : index
    %112 = vector.load %arg5[%c0_80, %c3, %c0_81, %c0_82] : memref<1x8x16x128xbf16, #tpu.memory_space<vmem>>, vector<1x1x16x128xbf16>
    %113 = vector.shape_cast %112 : vector<1x1x16x128xbf16> to vector<16x128xbf16>
    %114 = vector.shape_cast %111 : vector<16x128xbf16> to vector<1x1x16x128xbf16>
    tpu.vector_store %arg5[%c0_80, %c3, %c0_81, %c0_82], %114 {strides = array<i32>} : memref<1x8x16x128xbf16, #tpu.memory_space<vmem>>, vector<1x1x16x128xbf16>,
    %115 = vector.extract_strided_slice %94 {offsets = [96, 0], sizes = [16, 128], strides = [1, 1]} : vector<192x128xf32> to vector<16x128xf32>
    %116 = arith.truncf %115 : vector<16x128xf32> to vector<16x128xbf16>
    %c0_83 = arith.constant 0 : index
    %c4 = arith.constant 4 : index
    %c0_84 = arith.constant 0 : index
    %c0_85 = arith.constant 0 : index
    %117 = vector.load %arg5[%c0_83, %c4, %c0_84, %c0_85] : memref<1x8x16x128xbf16, #tpu.memory_space<vmem>>, vector<1x1x16x128xbf16>
    %118 = vector.shape_cast %117 : vector<1x1x16x128xbf16> to vector<16x128xbf16>
    %119 = vector.shape_cast %116 : vector<16x128xbf16> to vector<1x1x16x128xbf16>
    tpu.vector_store %arg5[%c0_83, %c4, %c0_84, %c0_85], %119 {strides = array<i32>} : memref<1x8x16x128xbf16, #tpu.memory_space<vmem>>, vector<1x1x16x128xbf16>,
    %120 = vector.extract_strided_slice %94 {offsets = [120, 0], sizes = [16, 128], strides = [1, 1]} : vector<192x128xf32> to vector<16x128xf32>
    %121 = arith.truncf %120 : vector<16x128xf32> to vector<16x128xbf16>
    %c0_86 = arith.constant 0 : index
    %c5 = arith.constant 5 : index
    %c0_87 = arith.constant 0 : index
    %c0_88 = arith.constant 0 : index
    %122 = vector.load %arg5[%c0_86, %c5, %c0_87, %c0_88] : memref<1x8x16x128xbf16, #tpu.memory_space<vmem>>, vector<1x1x16x128xbf16>
    %123 = vector.shape_cast %122 : vector<1x1x16x128xbf16> to vector<16x128xbf16>
    %124 = vector.shape_cast %121 : vector<16x128xbf16> to vector<1x1x16x128xbf16>
    tpu.vector_store %arg5[%c0_86, %c5, %c0_87, %c0_88], %124 {strides = array<i32>} : memref<1x8x16x128xbf16, #tpu.memory_space<vmem>>, vector<1x1x16x128xbf16>,
    %125 = vector.extract_strided_slice %94 {offsets = [144, 0], sizes = [16, 128], strides = [1, 1]} : vector<192x128xf32> to vector<16x128xf32>
    %126 = arith.truncf %125 : vector<16x128xf32> to vector<16x128xbf16>
    %c0_89 = arith.constant 0 : index
    %c6 = arith.constant 6 : index
    %c0_90 = arith.constant 0 : index
    %c0_91 = arith.constant 0 : index
    %127 = vector.load %arg5[%c0_89, %c6, %c0_90, %c0_91] : memref<1x8x16x128xbf16, #tpu.memory_space<vmem>>, vector<1x1x16x128xbf16>
    %128 = vector.shape_cast %127 : vector<1x1x16x128xbf16> to vector<16x128xbf16>
    %129 = vector.shape_cast %126 : vector<16x128xbf16> to vector<1x1x16x128xbf16>
    tpu.vector_store %arg5[%c0_89, %c6, %c0_90, %c0_91], %129 {strides = array<i32>} : memref<1x8x16x128xbf16, #tpu.memory_space<vmem>>, vector<1x1x16x128xbf16>,
    %130 = vector.extract_strided_slice %94 {offsets = [168, 0], sizes = [16, 128], strides = [1, 1]} : vector<192x128xf32> to vector<16x128xf32>
    %131 = arith.truncf %130 : vector<16x128xf32> to vector<16x128xbf16>
    %c0_92 = arith.constant 0 : index
    %c7 = arith.constant 7 : index
    %c0_93 = arith.constant 0 : index
    %c0_94 = arith.constant 0 : index
    %132 = vector.load %arg5[%c0_92, %c7, %c0_93, %c0_94] : memref<1x8x16x128xbf16, #tpu.memory_space<vmem>>, vector<1x1x16x128xbf16>
    %133 = vector.shape_cast %132 : vector<1x1x16x128xbf16> to vector<16x128xbf16>
    %134 = vector.shape_cast %131 : vector<16x128xbf16> to vector<1x1x16x128xbf16>
    tpu.vector_store %arg5[%c0_92, %c7, %c0_93, %c0_94], %134 {strides = array<i32>} : memref<1x8x16x128xbf16, #tpu.memory_space<vmem>>, vector<1x1x16x128xbf16>,
    return
  }
  func.func @transform_1(%arg0: i32, %arg1: i32) -> (i32, i32, i32, i32) {
    %c0_i32 = arith.constant 0 : i32
    %c0_i32_0 = arith.constant 0 : i32
    %c0_i32_1 = arith.constant 0 : i32
    %c0_i32_2 = arith.constant 0 : i32
    %c0_i32_3 = arith.constant 0 : i32
    return %c0_i32, %c0_i32_0, %c0_i32_1, %c0_i32_2 : i32, i32, i32, i32
  }
  func.func @transform_2(%arg0: i32, %arg1: i32) -> (i32, i32) {
    %c0_i32 = arith.constant 0 : i32
    %c0_i32_0 = arith.constant 0 : i32
    %c0_i32_1 = arith.constant 0 : i32
    return %c0_i32, %c0_i32_0 : i32, i32
  }
  func.func @transform_3(%arg0: i32, %arg1: i32) -> (i32, i32, i32, i32) {
    %c0_i32 = arith.constant 0 : i32
    %c0_i32_0 = arith.constant 0 : i32
    %c0_i32_1 = arith.constant 0 : i32
    return %arg0, %arg1, %c0_i32, %c0_i32_0 : i32, i32, i32, i32
  }
}

</mosaic_0001>

<bundles_post_ra>
// kernel: basic_conv_forward.1
= control target key start
LH: loop header
LB: loop body
LE: loop exit
PB: predicated region body
PF: predicated region fallthrough
CT: control target
= control target key end

     0   :  { %s4564_s12 = smov 0   ;;  %s4566_s13 = smov 0   ;;  %s5438_s0 = inlined_call_operand.vmem [shape: bf16[2,456,128], index: 0, kind: input, shape index: {}]   ;;  %s5439_s1 = inlined_call_operand.vmem [shape: bf16[3,3,128,128], index: 1, kind: input, shape index: {}]   ;;  %s5440_s2 = inlined_call_operand.vmem [shape: f32[1,128], index: 2, kind: input, shape index: {}]   ;;  %s5441_s3 = inlined_call_operand.vmem [shape: bf16[2,16,16,128], index: 3, kind: output, shape index: {}]  }
   0x1   :  { %s4568_s14 = smov 0   ;;  %s4570_s15 = smov 0  }
   0x2   :  { %s4572_s16 = smov 0  }
   0x3 LB: > { %s22_s17 = sadd.s32 1, %s4534_s14  ;;  %s25_s18 = sadd.s32 1, %s4538_s15  ;;  %s4542_s16 = sphi %s4572_s16, %s13_s16   ;;  %s4538_s15 = sphi %s4570_s15, %s5445_s15   ;;  %s4534_s14 = sphi %s4568_s14, %s5444_s14   ;;  %s4530_s13 = sphi %s4566_s13, %s5443_s13   ;;  %s4526_s12 = sphi %s4564_s12, %s5442_s12  }
   0x4   : > { %p23_p0 = scmp.ge.s32.totalorder %s22_s17, 2  ;;  %p3382_p1 = scmp.ge.s32.totalorder %s4542_s16, 1 }
   0x5   : > { %p117_p2 = scmp.lt.s32.totalorder %s4542_s16, 5 }
   0x6   : > { %s5447_s17 = smov (%p23_p0, %s22_s17), 0  ;;  %s5449_s18 = smov (!%p23_p0, %s25_s18), %s4538_s15 }
   0x7   : > { %p118_p3 = pnand %p3382_p1, %p117_p2  ;;  %p27_p4 = scmp.ge.s32.totalorder %s5449_s18, 2 }
   0x8   : > { %s3383_s19 = sshll.u32 (!%p118_p3), %s4526_s12, 3  ;;  %p140_p5 = scmp.lt.s32.totalorder (!%p118_p3), %s4530_s13, 1 }
   0x9   : > { %s5451_s18 = smov (%p27_p4, %s5449_s18), 0  ;;  %121 = sbr.rel (%p118_p3) target bundleno = 529 (0x211), region = 28 }
   0xa   : > { %p142_p6 = scmp.lt.s32.totalorder (!%p118_p3), %s3383_s19, 15  ;;  %p151_p7 = scmp.lt.s32.totalorder (!%p118_p3), %s4526_s12, 0 }
   0xb   : > { %s152_s22 = ssub.s32 (!%p118_p3), 0, %s4526_s12  ;;  %p3390_p9 = scmp.ne.s32.totalorder (!%p118_p3), %s4526_s12, 0 }
   0xc   : > { %s3387_s24 = smin.u32 (!%p118_p3), %s4526_s12, %s152_s22 }
   0xd   : > { %s154_s26 = sand.u32 (!%p118_p3), 1, %s3387_s24  }
   0xe   : > { %s155_s28 = ssub.s32 (!%p118_p3), 0, %s154_s26 }
  0x10   : > { %s141_s20 = scalar_select %p140_p5, %s4530_s13, 1 }
  0x11   : > { %s5453_s19 = smov (!%p142_p6, %s3383_s19), 15  ;;  %s5455_s28 = smov (!%p151_p7, %s155_s28), %s154_s26 }
  0x12   : > { %s3385_s21 = sshll.u32 %s141_s20, 5  ;;  %s3384_s23 = sshll.u32 %s5453_s19, 1 }
  0x13   : > { %s146_s25 = sadd.s32 %s3385_s21, %s3384_s23  ;;  %p3389_p8 = scmp.lt.s32.totalorder %s5455_s28, 0 }
  0x14   : > { %s3386_s27 = sshll.u32 %s146_s25, 2  ;;  %s161_s5 = sadd.s32 2, %s5455_s28 }
  0x15   : > { %s4607_s4 = scalar_lea.vmem %s5441_s3, %s3386_s27  ;;  %s5457_s5 = smov (!%p3389_p8, %s161_s5), %s5455_s28 }
  0x16   : > { %166 = sbr.rel (%p3390_p9) target bundleno = 40 (0x28), region = 32  ;;  %s177_s23 = scalar_lea.sflag (!%p3390_p9), [#allocation3], %s5457_s5 }
  0x17   : > { %s167_s6 = smul.u32 (!%p3390_p9), 192, %s4526_s12 }
  0x18   : > { %s170_s7 = smul.u32 (!%p3390_p9), 57, %s4530_s13 }
  0x19   : > { %s168_s8 = sshra.s32 (!%p3390_p9), %s167_s6, 3  ;;  %s3702_s9 = smul.u32 (!%p3390_p9), 132, %s5457_s5 }
  0x1a   : > { %s171_s10 = sadd.s32 (!%p3390_p9), %s170_s7, %s168_s8 }
  0x1b   : > { %s3391_s11 = sshll.u32 (!%p3390_p9), %s171_s10, 2  ;;  %s4623_s22 = scalar_lea.vmem (!%p3390_p9), [#allocation2], %s3702_s9 }
  0x1c   : > { %s4618_s21 = scalar_lea.vmem (!%p3390_p9), %s5438_s0, %s3391_s11 }
  0x1d   : > { %v215_v0 = vld [vmem:[%s4618_s21] sm:$0xff]  ;;  %v217_v1 = vld [vmem:[%s4618_s21 + $0x8] sm:$0xff]  ;;  %v219_v2 = vld [vmem:[%s4618_s21 + $0x10] sm:$0xff] }
  0x1e   : > { %216 = vst [vmem:[%s4623_s22] sm:$0xff] %v215_v0  ;;  %218 = vst [vmem:[%s4623_s22 + $0x8] sm:$0xff] %v217_v1  ;;  %v221_v3 = vld [vmem:[%s4618_s21 + $0x18] sm:$0xff]  ;;  %v223_v4 = vld [vmem:[%s4618_s21 + $0x20] sm:$0xff] }
  0x1f   : > { %220 = vst [vmem:[%s4623_s22 + $0x10] sm:$0xff] %v219_v2  ;;  %v225_v5 = vld [vmem:[%s4618_s21 + $0x28] sm:$0xff]  ;;  %222 = vst [vmem:[%s4623_s22 + $0x18] sm:$0xff] %v221_v3  ;;  %v227_v6 = vld [vmem:[%s4618_s21 + $0x30] sm:$0xff] }
  0x20   : > { %224 = vst [vmem:[%s4623_s22 + $0x20] sm:$0xff] %v223_v4  ;;  %226 = vst [vmem:[%s4623_s22 + $0x28] sm:$0xff] %v225_v5  ;;  %v229_v7 = vld [vmem:[%s4618_s21 + $0x38] sm:$0xff]  ;;  %v231_v8 = vld [vmem:[%s4618_s21 + $0x40] sm:$0xff] }
  0x21   : > { %228 = vst [vmem:[%s4623_s22 + $0x30] sm:$0xff] %v227_v6  ;;  %230 = vst [vmem:[%s4623_s22 + $0x38] sm:$0xff] %v229_v7  ;;  %v233_v9 = vld [vmem:[%s4618_s21 + $0x48] sm:$0xff]  ;;  %v235_v10 = vld [vmem:[%s4618_s21 + $0x50] sm:$0xff] }
  0x22   : > { %232 = vst [vmem:[%s4623_s22 + $0x40] sm:$0xff] %v231_v8  ;;  %v237_v11 = vld [vmem:[%s4618_s21 + $0x58] sm:$0xff]  ;;  %234 = vst [vmem:[%s4623_s22 + $0x48] sm:$0xff] %v233_v9  ;;  %v239_v12 = vld [vmem:[%s4618_s21 + $0x60] sm:$0xff] }
  0x23   : > { %236 = vst [vmem:[%s4623_s22 + $0x50] sm:$0xff] %v235_v10  ;;  %238 = vst [vmem:[%s4623_s22 + $0x58] sm:$0xff] %v237_v11  ;;  %v241_v13 = vld [vmem:[%s4618_s21 + $0x68] sm:$0xff]  ;;  %v243_v14 = vld [vmem:[%s4618_s21 + $0x70] sm:$0xff] }
  0x24   : > { %240 = vst [vmem:[%s4623_s22 + $0x60] sm:$0xff] %v239_v12  ;;  %242 = vst [vmem:[%s4623_s22 + $0x68] sm:$0xff] %v241_v13  ;;  %v245_v15 = vld [vmem:[%s4618_s21 + $0x78] sm:$0xff]  ;;  %v3393_v16 = vld [vmem:[%s4618_s21 + $0x80] sm:$0xf] }
  0x25   : > { %244 = vst [vmem:[%s4623_s22 + $0x70] sm:$0xff] %v243_v14  ;;  %246 = vst [vmem:[%s4623_s22 + $0x78] sm:$0xff] %v245_v15 }
  0x26   : > { %3394 = vst [vmem:[%s4623_s22 + $0x80] sm:$0xf] %v3393_v16 }
  0x27   : > { %261 = vsyncadd %s177_s23, 2112 }
  0x28 PF: > { %s262_s24 = scalar_lea.sflag [#allocation3], %s5457_s5 }
  0x29   : > { %4522 = dma.done.wait %s262_s24, 2112 }
  0x2a   : > { %4523 = vsyncadd %s262_s24, 4294965184  ;;  %s267_s25 = sadd.s32 1, %s4526_s12 }
  0x2b   : > { %p3395_p10 = scmp.ge.s32.totalorder %s267_s25, 2 }
  0x2c   : > { %s272_s26 = ssub.s32 (!%p3395_p10), 1, %s5457_s5  ;;  %s273_s27 = smul.u32 (!%p3395_p10), 192, %s267_s25 }
  0x2d   : > { %271 = sbr.rel (%p3395_p10) target bundleno = 62 (0x3e), region = 73 }
  0x2e   : > { %s276_s28 = smul.u32 (!%p3395_p10), 57, %s4530_s13  ;;  %s274_s29 = sshra.s32 (!%p3395_p10), %s273_s27, 3 }
  0x2f   : > { %s3703_s30 = smul.u32 (!%p3395_p10), 132, %s272_s26  ;;  %s283_s13 = scalar_lea.sflag (!%p3395_p10), [#allocation3], %s272_s26 }
  0x30   : > { %s277_s6 = sadd.s32 (!%p3395_p10), %s276_s28, %s274_s29 }
  0x31   : > { %s3396_s7 = sshll.u32 (!%p3395_p10), %s277_s6, 2  ;;  %s4671_s12 = scalar_lea.vmem (!%p3395_p10), [#allocation2], %s3703_s30 }
  0x32   : > { %s4666_s10 = scalar_lea.vmem (!%p3395_p10), %s5438_s0, %s3396_s7 }
  0x33   : > { %v321_v17 = vld [vmem:[%s4666_s10] sm:$0xff] (!%p3395_p10)  ;;  %v323_v18 = vld [vmem:[%s4666_s10 + $0x8] sm:$0xff] (!%p3395_p10)  ;;  %v325_v19 = vld [vmem:[%s4666_s10 + $0x10] sm:$0xff] (!%p3395_p10) }
  0x34   : > { %322 = vst [vmem:[%s4671_s12] sm:$0xff] %v321_v17  ;;  %324 = vst [vmem:[%s4671_s12 + $0x8] sm:$0xff] %v323_v18  ;;  %v327_v20 = vld [vmem:[%s4666_s10 + $0x18] sm:$0xff]  ;;  %v329_v21 = vld [vmem:[%s4666_s10 + $0x20] sm:$0xff] }
  0x35   : > { %326 = vst [vmem:[%s4671_s12 + $0x10] sm:$0xff] %v325_v19  ;;  %v331_v22 = vld [vmem:[%s4666_s10 + $0x28] sm:$0xff]  ;;  %328 = vst [vmem:[%s4671_s12 + $0x18] sm:$0xff] %v327_v20  ;;  %v333_v23 = vld [vmem:[%s4666_s10 + $0x30] sm:$0xff] }
  0x36   : > { %330 = vst [vmem:[%s4671_s12 + $0x20] sm:$0xff] %v329_v21  ;;  %332 = vst [vmem:[%s4671_s12 + $0x28] sm:$0xff] %v331_v22  ;;  %v335_v24 = vld [vmem:[%s4666_s10 + $0x38] sm:$0xff]  ;;  %v337_v25 = vld [vmem:[%s4666_s10 + $0x40] sm:$0xff] }
  0x37   : > { %334 = vst [vmem:[%s4671_s12 + $0x30] sm:$0xff] %v333_v23  ;;  %336 = vst [vmem:[%s4671_s12 + $0x38] sm:$0xff] %v335_v24  ;;  %v339_v26 = vld [vmem:[%s4666_s10 + $0x48] sm:$0xff]  ;;  %v341_v27 = vld [vmem:[%s4666_s10 + $0x50] sm:$0xff] }
  0x38   : > { %338 = vst [vmem:[%s4671_s12 + $0x40] sm:$0xff] %v337_v25  ;;  %v343_v28 = vld [vmem:[%s4666_s10 + $0x58] sm:$0xff]  ;;  %340 = vst [vmem:[%s4671_s12 + $0x48] sm:$0xff] %v339_v26  ;;  %v345_v29 = vld [vmem:[%s4666_s10 + $0x60] sm:$0xff] }
  0x39   : > { %342 = vst [vmem:[%s4671_s12 + $0x50] sm:$0xff] %v341_v27  ;;  %344 = vst [vmem:[%s4671_s12 + $0x58] sm:$0xff] %v343_v28  ;;  %v347_v30 = vld [vmem:[%s4666_s10 + $0x68] sm:$0xff]  ;;  %v349_v31 = vld [vmem:[%s4666_s10 + $0x70] sm:$0xff] }
  0x3a   : > { %346 = vst [vmem:[%s4671_s12 + $0x60] sm:$0xff] %v345_v29  ;;  %348 = vst [vmem:[%s4671_s12 + $0x68] sm:$0xff] %v347_v30  ;;  %v351_v32 = vld [vmem:[%s4666_s10 + $0x78] sm:$0xff]  ;;  %v3398_v33 = vld [vmem:[%s4666_s10 + $0x80] sm:$0xf] }
  0x3b   : > { %350 = vst [vmem:[%s4671_s12 + $0x70] sm:$0xff] %v349_v31  ;;  %352 = vst [vmem:[%s4671_s12 + $0x78] sm:$0xff] %v351_v32 }
  0x3c   : > { %3399 = vst [vmem:[%s4671_s12 + $0x80] sm:$0xf] %v3398_v33 }
  0x3d   : > { %367 = vsyncadd %s283_s13, 2112 }
  0x3e PF: > { %v4364_v34 = vld [vmem:[%s5439_s1 + $0x40] sm:$0xff]   ;;  %v4366_v36 = vld [vmem:[%s5439_s1 + $0x48] sm:$0xff]   ;;  %v4368_v38 = vld [vmem:[%s5439_s1 + $0x50] sm:$0xff]   ;;  %s3704_s9 = smul.u32 132, %s5457_s5  ;;  %vm493_vm0 = vsmask.f32 7424 }
  0x3f   : > { %v4365_v35 = vld [vmem:[%s5439_s1] sm:$0xff]   ;;  %3948 = vmatprep.subr.bf16.mxu0 %v4364_v34  ;;  %v4367_v37 = vld [vmem:[%s5439_s1 + $0x8] sm:$0xff]   ;;  %v4369_v39 = vld [vmem:[%s5439_s1 + $0x10] sm:$0xff]   ;;  %vm977_vm1 = vcmask 1046528  }
  0x40   : > { %3988 = vmatprep.subr.bf16.mxu1 %v4365_v35  ;;  %3949 = vmatpush3.bf16.msra.mxu0 %v4364_v34  ;;  %v4370_v40 = vld [vmem:[%s5439_s1 + $0x58] sm:$0xff]   ;;  %v4372_v42 = vld [vmem:[%s5439_s1 + $0x60] sm:$0xff]   ;;  %v4374_v44 = vld [vmem:[%s5439_s1 + $0x68] sm:$0xff]   ;;  %s4743_s5 = scalar_lea.vmem [#allocation2], %s3704_s9 }
  0x41   : > { %3989 = vmatpush3.bf16.msra.mxu1 %v4365_v35  ;;  %3950 = vmatprep.subr.bf16.mxu0 %v4366_v36  ;;  %v4371_v41 = vld [vmem:[%s5439_s1 + $0x18] sm:$0xff]   ;;  %v4373_v43 = vld [vmem:[%s5439_s1 + $0x20] sm:$0xff]   ;;  %v4375_v45 = vld [vmem:[%s5439_s1 + $0x28] sm:$0xff]  }
  0x42   : > { %3990 = vmatprep.subr.bf16.mxu1 %v4367_v37  ;;  %v4376_v51 = vld [vmem:[%s5439_s1 + $0x70] sm:$0xff]   ;;  %v4378_v58 = vld [vmem:[%s5439_s1 + $0x78] sm:$0xff]   ;;  %v4383_v6 = vld [vmem:[%s5439_s1 + $0x80] sm:$0xff]  }
  0x43   : > { %v4377_v55 = vld [vmem:[%s5439_s1 + $0x30] sm:$0xff]   ;;  %v4379_v63 = vld [vmem:[%s5439_s1 + $0x38] sm:$0xff]   ;;  %v4384_v7 = vld [vmem:[%s5439_s1 + $0xc0] sm:$0xff]  }
  0x44   : > { %3951 = vmatpush3.bf16.msra.mxu0 %v4366_v36  ;;  %v4787_v8 = vld [vmem:[%s4743_s5 + $0x28] sm:$0xff]   ;;  %v4802_v19 = vld [vmem:[%s4743_s5 + $0x30] sm:$0xff]   ;;  %v4809_v23 = vld [vmem:[%s4743_s5 + $0x38] sm:$0xff]  }
  0x45   : > { %3991 = vmatpush3.bf16.msra.mxu1 %v4367_v37  ;;  %3952 = vmatprep.subr.bf16.mxu0 %v4368_v38  ;;  %v372_v46 = vld [vmem:[%s4743_s5] sm:$0xf]  ;;  %v4747_v47 = vld [vmem:[%s4743_s5 + $0x4] sm:$0xf]  ;;  %v4751_v49 = vld [vmem:[%s4743_s5 + $0x8] sm:$0xff]   ;;  %v534_v17 = vshll.u32 %v4787_v8, 16 }
  0x46   : > { %3992 = vmatprep.subr.bf16.mxu1 %v4369_v39  ;;  %v3417_v48 = vcombine.low %v372_v46, %v4747_v47  ;;  %v4754_v50 = vld [vmem:[%s4743_s5 + $0x10] sm:$0xff]   ;;  %v502_v54 = vshll.u32 %v4751_v49, 16  ;;  %v506_v59 = vshrl.u32 %v4751_v49, 16  ;;  %v4769_v62 = vld [vmem:[%s4743_s5 + $0x18] sm:$0xff]   ;;  %v4778_v5 = vld [vmem:[%s4743_s5 + $0x20] sm:$0xff]   ;;  %v542_v27 = vshll.u32 %v4802_v19, 16 }
  0x47   : > { %v510_v60 = vshll.u32 %v4754_v50, 16  ;;  %v514_v1 = vshrl.u32 %v4754_v50, 16  ;;  %v518_v2 = vshll.u32 %v4769_v62, 16  ;;  %v4385_v9 = vld [vmem:[%s5439_s1 + $0x88] sm:$0xff]   ;;  %v522_v13 = vshrl.u32 %v4769_v62, 16  ;;  %v4389_v22 = vld [vmem:[%s5439_s1 + $0x90] sm:$0xff]  }
  0x48   : > { %3953 = vmatpush3.bf16.msra.mxu0 %v4368_v38  ;;  %v495_v52 = vshrl.u32 %v3417_v48, 16  ;;  %v497_v53 = vshll.u32 %v3417_v48, 16  ;;  %4004 = vmatprep.mubr.bf16.mxu1 %v3417_v48  ;;  %v504_v57 = vrot.slane %v502_v54, 1  ;;  %v526_v14 = vshll.u32 %v4778_v5, 16  ;;  %v4386_v15 = vld [vmem:[%s5439_s1 + $0xc8] sm:$0xff]   ;;  %v4390_v24 = vld [vmem:[%s5439_s1 + $0xd0] sm:$0xff]  }
  0x49   : > { %3993 = vmatpush3.bf16.msra.mxu1 %v4369_v39  ;;  %3954 = vmatprep.subr.bf16.mxu0 %v4370_v40  ;;  %v512_v4 = vrot.slane %v510_v60, 1  ;;  %v520_v11 = vrot.slane %v518_v2, 1  ;;  %v530_v16 = vshrl.u32 %v4778_v5, 16  ;;  %v536_v26 = vrot.slane %v534_v17, 1  ;;  %v4393_v30 = vld [vmem:[%s5439_s1 + $0x98] sm:$0xff]   ;;  %v4828_v36 = vld [vmem:[%s4743_s5 + $0x40] sm:$0xff]  }
  0x4a   : > { %3994 = vmatprep.subr.bf16.mxu1 %v4371_v41  ;;  %v499_v56 = vrot.slane %v497_v53, 1  ;;  %v508_v3 = vor.u32 %v506_v59, %v504_v57  ;;  %v528_v21 = vrot.slane %v526_v14, 1  ;;  %v538_v29 = vshrl.u32 %v4787_v8, 16  ;;  %v4394_v34 = vld [vmem:[%s5439_s1 + $0xd8] sm:$0xff]   ;;  %v4399_v46 = vld [vmem:[%s5439_s1 + $0xa8] sm:$0xff]   ;;  %v4403_v60 = vld [vmem:[%s5439_s1 + $0xb0] sm:$0xff]  }
  0x4b   : > { %v516_v10 = vor.u32 %v514_v1, %v512_v4  ;;  %v524_v20 = vor.u32 %v522_v13, %v520_v11  ;;  %v546_v31 = vshrl.u32 %v4802_v19, 16  ;;  %v550_v32 = vshll.u32 %v4809_v23, 16  ;;  %v956_v14 = vld [vmem:[%s4743_s5] sm:$0xe] }
  0x4c   : > { %3955 = vmatpush3.bf16.msra.mxu0 %v4370_v40  ;;  %v500_v61 = vor.u32 %v499_v56, %v495_v52  ;;  %v513_v12 = vsel %vm493_vm0, %v508_v3, %v512_v4  ;;  %v532_v25 = vor.u32 %v530_v16, %v528_v21  ;;  %v544_v35 = vrot.slane %v542_v27, 1  ;;  %v4397_v40 = vld [vmem:[%s5439_s1 + $0xa0] sm:$0xff]  }
  0x4d   : > { %3995 = vmatpush3.bf16.msra.mxu1 %v4371_v41  ;;  %3956 = vmatprep.subr.bf16.mxu0 %v4372_v42  ;;  %v521_v18 = vsel %vm493_vm0, %v516_v10, %v520_v11  ;;  %v529_v28 = vsel %vm493_vm0, %v524_v20, %v528_v21  ;;  %v540_v37 = vor.u32 %v538_v29, %v536_v26  ;;  %v552_v39 = vrot.slane %v550_v32, 1  ;;  %v4835_v41 = vld [vmem:[%s4743_s5 + $0x48] sm:$0xff]   ;;  %v4408_v10 = vld [vmem:[%s5439_s1 + $0xf8] sm:$0xff]   ;;  %v4413_v16 = vld [vmem:[%s5439_s1 + $0x140] sm:$0xff]  }
  0x4e   : > { %3996 = vmatprep.subr.bf16.mxu1 %v4373_v43  ;;  %v505_v0 = vsel %vm493_vm0, %v500_v61, %v504_v57  ;;  %v537_v33 = vsel %vm493_vm0, %v532_v25, %v536_v26  ;;  %v548_v38 = vor.u32 %v546_v31, %v544_v35  ;;  %v562_v52 = vshrl.u32 %v4828_v36, 16  ;;  %v4858_v57 = vld [vmem:[%s4743_s5 + $0x58] sm:$0xff]   ;;  %v4410_v29 = vld [vmem:[%s4743_s5 + $0xc] sm:$0xff]  }
  0x4f   : > { %3964 = vmatprep.mubr.bf16.mxu0 %v505_v0  ;;  %v566_v53 = vshll.u32 %v4835_v41, 16  ;;  %v570_v1 = vshrl.u32 %v4835_v41, 16  ;;  %v582_v2 = vshll.u32 %v4858_v57, 16  ;;  %v979_v27 = vrot.slane %v4751_v49, 1 }
  0x50   : > { %3957 = vmatpush3.bf16.msra.mxu0 %v4372_v42  ;;  %v4398_v42 = vld [vmem:[%s5439_s1 + $0xe0] sm:$0xff]   ;;  %v553_v48 = vsel %vm493_vm0, %v548_v38, %v552_v39  ;;  %v983_v31 = vrot.slane %v4769_v62, 1  ;;  %v4419_v38 = vld [vmem:[%s5439_s1 + $0x150] sm:$0xff]  }
  0x51   : > { %3997 = vmatpush3.bf16.msra.mxu1 %v4373_v43  ;;  %3958 = vmatprep.subr.bf16.mxu0 %v4374_v44  ;;  %v558_v43 = vshll.u32 %v4828_v36, 16  ;;  %v568_v59 = vrot.slane %v566_v53, 1  ;;  %v4421_v53 = vld [vmem:[%s4743_s5 + $0x34] sm:$0xff]  }
  0x52   : > { %3998 = vmatprep.subr.bf16.mxu1 %v4375_v45 }
  0x53   : > { %v560_v54 = vrot.slane %v558_v43, 1  ;;  %v572_v11 = vor.u32 %v570_v1, %v568_v59  ;;  %v4420_v43 = vld [vmem:[%s4743_s5 + $0x2c] sm:$0xff]   ;;  %v4425_v1 = vld [vmem:[%s4743_s5 + $0x44] sm:$0xff]  }
  0x54   : > { %3959 = vmatpush3.bf16.msra.mxu0 %v4374_v44  ;;  %v545_v44 = vsel %vm493_vm0, %v540_v37, %v544_v35  ;;  %v4416_v35 = vld [vmem:[%s4743_s5 + $0x1c] sm:$0xff]  }
  0x55   : > { %3999 = vmatpush3.bf16.msra.mxu1 %v4375_v45  ;;  %3960 = vmatprep.subr.bf16.mxu0 %v4376_v51  ;;  %v554_v45 = vshrl.u32 %v4809_v23, 16 }
  0x56   : > { %4000 = vmatprep.subr.bf16.mxu1 %v4377_v55 }
  0x57   : > { %v556_v56 = vor.u32 %v554_v45, %v552_v39  ;;  %v987_v39 = vrot.slane %v4787_v8, 1  ;;  %v989_v45 = vrot.slane %v4802_v19, 1 }
  0x58   : > { %3961 = vmatpush3.bf16.msra.mxu0 %v4376_v51  ;;  %v4400_v51 = vld [vmem:[%s5439_s1 + $0xe8] sm:$0xff]  }
  0x59   : > { %4001 = vmatpush3.bf16.msra.mxu1 %v4377_v55  ;;  %3962 = vmatprep.subr.bf16.mxu0 %v4378_v58  ;;  %v4854_v55 = vld [vmem:[%s4743_s5 + $0x50] sm:$0xff]   ;;  %v561_v0 = vsel %vm493_vm0, %v556_v56, %v560_v54  ;;  %v993_v56 = vrot.slane %v4828_v36, 1 }
  0x5a   : > { %4002 = vmatprep.subr.bf16.mxu1 %v4379_v63  ;;  %v574_v61 = vshll.u32 %v4854_v55, 16  ;;  %v578_v4 = vshrl.u32 %v4854_v55, 16 }
  0x5c   : > { %3963 = vmatpush3.bf16.msra.mxu0 %v4378_v58  ;;  %v564_v58 = vor.u32 %v562_v52, %v560_v54  ;;  %v990_v52 = vsel %vm977_vm1, %v987_v39, %v989_v45  ;;  %v4428_v54 = vld [vmem:[%s5439_s1 + $0x128] sm:$0xff]  }
  0x5d   : > { %4003 = vmatpush3.bf16.msra.mxu1 %v4379_v63  ;;  %4028 = vmatprep.subr.bf16.mxu0 %v4383_v6  ;;  %v4404_v63 = vld [vmem:[%s5439_s1 + $0xf0] sm:$0xff]  }
  0x5e   : > { %4068 = vmatprep.subr.bf16.mxu1 %v4384_v7  ;;  %v569_v3 = vsel %vm493_vm0, %v564_v58, %v568_v59  ;;  %v4429_v58 = vld [vmem:[%s5439_s1 + $0x168] sm:$0xff]   ;;  %v995_v59 = vrot.slane %v4835_v41, 1 }
  0x5f   : > { %3965 = vmatmul.mubr.bf16.vlgmr.msra.gmra.mrb[0].mxu0 %v513_v12  ;;  %v584_v12 = vrot.slane %v582_v2, 1 }
  0x60   : > { %4005 = vmatmul.mubr.bf16.vlgmr.msra.gmra.mrb[0].mxu1 %v4751_v49  ;;  %4029 = vmatpush3.bf16.msra.mxu0 %v4383_v6  ;;  %v4874_v6 = vld [vmem:[%s4743_s5 + $0x60] ss:$0 sps:$4 sm:$0x11]   ;;  %v4414_v49 = vld [vmem:[%s5439_s1 + $0x108] sm:$0xff]   ;;  %v996_v2 = vsel %vm977_vm1, %v993_v56, %v995_v59 }
  0x61   : > { %4069 = vmatpush3.bf16.msra.mxu1 %v4384_v7  ;;  %4030 = vmatprep.subr.bf16.mxu0 %v4385_v9  ;;  %v4407_v7 = vld [vmem:[%s5439_s1 + $0xb8] sm:$0xff]   ;;  %v590_v20 = vshll.u32 %v4874_v6, 16 }
  0x62   : > { %4070 = vmatprep.subr.bf16.mxu1 %v4386_v15  ;;  %3968 = vmatprep.mubr.bf16.mxu0 %v521_v18  ;;  %v586_v18 = vshrl.u32 %v4858_v57, 16 }
  0x63   : > { %4008 = vmatprep.mubr.bf16.mxu1 %v4754_v50  ;;  %v592_v25 = vrot.slane %v590_v20, 1 }
  0x64   : > { %4031 = vmatpush3.bf16.msra.mxu0 %v4385_v9  ;;  %v576_v9 = vrot.slane %v574_v61, 1  ;;  %v1498_v61 = vld [vmem:[%s4743_s5 + $0xc] sm:$0xf] }
  0x65   : > { %4071 = vmatpush3.bf16.msra.mxu1 %v4386_v15  ;;  %4032 = vmatprep.subr.bf16.mxu0 %v4389_v22  ;;  %v4412_v15 = vld [vmem:[%s5439_s1 + $0x100] sm:$0xff]  }
  0x66   : > { %4072 = vmatprep.subr.bf16.mxu1 %v4390_v24  ;;  %v580_v13 = vor.u32 %v578_v4, %v576_v9  ;;  %v577_v17 = vsel %vm493_vm0, %v572_v11, %v576_v9  ;;  %v4436_v4 = vld [vmem:[%s5439_s1 + $0x138] sm:$0xff]   ;;  %v997_v9 = vrot.slane %v4854_v55, 1 }
  0x67   : > { %3969 = vmatmul.mubr.bf16.gmra.mrb[4].mxu0 %v529_v28  ;;  %v4439_v11 = vld [vmem:[%s4743_s5 + $0x14] sm:$0xff]  }
  0x68   : > { %4009 = vmatmul.mubr.bf16.gmra.mrb[4].mxu1 %v4769_v62  ;;  %4033 = vmatpush3.bf16.msra.mxu0 %v4389_v22  ;;  %v585_v21 = vsel %vm493_vm0, %v580_v13, %v584_v12  ;;  %v3462_v22 = vcombine.low %v956_v14, %v4747_v47  ;;  %v4418_v62 = vld [vmem:[%s5439_s1 + $0x110] sm:$0xff]  }
  0x69   : > { %4073 = vmatpush3.bf16.msra.mxu1 %v4390_v24  ;;  %3972 = vmatprep.mubr.bf16.mxu0 %v537_v33  ;;  %v588_v24 = vor.u32 %v586_v18, %v584_v12  ;;  %v4411_v33 = vld [vmem:[%s4743_s5 + $0x14] sm:$0xff]   ;;  %v1900_v14 = vld [vmem:[%s4743_s5 + $0xc] sm:$0xe] }
  0x6a   : > { %4012 = vmatprep.mubr.bf16.mxu1 %v4778_v5  ;;  %4034 = vmatprep.subr.bf16.mxu0 %v4393_v30  ;;  %v978_v26 = vrot.slane %v3462_v22, 1  ;;  %v4431_v13 = vld [vmem:[%s4743_s5 + $0x54] sm:$0xff]  }
  0x6b   : > { %4074 = vmatprep.subr.bf16.mxu1 %v4394_v34  ;;  %v593_v28 = vsel %vm493_vm0, %v588_v24, %v592_v25  ;;  %v1001_v24 = vrot.slane %v4874_v6, 1  ;;  %v4441_v25 = vld [vmem:[%s4743_s5 + $0x1c] sm:$0xff]  }
  0x6c   : > { %4035 = vmatpush3.bf16.msra.mxu0 %v4393_v30  ;;  %v980_v47 = vsel %vm977_vm1, %v978_v26, %v979_v27  ;;  %v981_v30 = vrot.slane %v4754_v50, 1  ;;  %v985_v50 = vrot.slane %v4778_v5, 1  ;;  %v4417_v5 = vld [vmem:[%s4743_s5 + $0x24] sm:$0xff]   ;;  %v1623_v6 = vshrl.u32 %v4441_v25, 16 }
  0x6d   : > { %4075 = vmatpush3.bf16.msra.mxu1 %v4394_v34  ;;  %4036 = vmatprep.subr.bf16.mxu0 %v4397_v40  ;;  %v4415_v34 = vld [vmem:[%s5439_s1 + $0x148] sm:$0xff]  }
  0x6e   : > { %4076 = vmatprep.subr.bf16.mxu1 %v4398_v42  ;;  %v982_v32 = vsel %vm977_vm1, %v979_v27, %v981_v30  ;;  %v984_v37 = vsel %vm977_vm1, %v981_v30, %v983_v31  ;;  %v4446_v30 = vld [vmem:[%s4743_s5 + $0x24] sm:$0xff]  }
  0x6f   : > { %3973 = vmatmul.mubr.bf16.gmra.mrb[8].mxu0 %v545_v44  ;;  %v4422_v44 = vld [vmem:[%s5439_s1 + $0x118] sm:$0xff]  }
  0x70   : > { %4013 = vmatmul.mubr.bf16.gmra.mrb[8].mxu1 %v4787_v8  ;;  %3976 = vmatprep.mubr.bf16.mxu0 %v553_v48  ;;  %v4423_v8 = vld [vmem:[%s5439_s1 + $0x158] sm:$0xff]   ;;  %v4426_v48 = vld [vmem:[%s5439_s1 + $0x120] sm:$0xff]  }
  0x71   : > { %4016 = vmatprep.mubr.bf16.mxu1 %v4802_v19  ;;  %4037 = vmatpush3.bf16.msra.mxu0 %v4397_v40  ;;  %v986_v40 = vsel %vm977_vm1, %v983_v31, %v985_v50 }
  0x72   : > { %4077 = vmatpush3.bf16.msra.mxu1 %v4398_v42  ;;  %4038 = vmatprep.subr.bf16.mxu0 %v4399_v46  ;;  %v988_v42 = vsel %vm977_vm1, %v985_v50, %v987_v39  ;;  %v4994_v39 = vld [vmem:[%s4743_s5 + $0x34] sm:$0xff]  }
  0x73   : > { %4078 = vmatprep.subr.bf16.mxu1 %v4400_v51 }
  0x75   : > { %4039 = vmatpush3.bf16.msra.mxu0 %v4399_v46  ;;  %v991_v46 = vrot.slane %v4809_v23, 1 }
  0x76   : > { %4079 = vmatpush3.bf16.msra.mxu1 %v4400_v51  ;;  %4040 = vmatprep.subr.bf16.mxu0 %v4403_v60  ;;  %v4427_v51 = vld [vmem:[%s5439_s1 + $0x160] sm:$0xff]  }
  0x77   : > { %3977 = vmatmul.mubr.bf16.gmra.mrb[12].mxu0 %v561_v0  ;;  %4080 = vmatprep.subr.bf16.mxu1 %v4404_v63  ;;  %v992_v19 = vsel %vm977_vm1, %v989_v45, %v991_v46  ;;  %v994_v0 = vsel %vm977_vm1, %v991_v46, %v993_v56 }
  0x78   : > { %4017 = vmatmul.mubr.bf16.gmra.mrb[12].mxu1 %v4809_v23  ;;  %3980 = vmatprep.mubr.bf16.mxu0 %v569_v3  ;;  %v4424_v23 = vld [vmem:[%s4743_s5 + $0x3c] sm:$0xff]  }
  0x79   : > { %4020 = vmatprep.mubr.bf16.mxu1 %v4828_v36  ;;  %4041 = vmatpush3.bf16.msra.mxu0 %v4403_v60  ;;  %v4432_v60 = vld [vmem:[%s5439_s1 + $0x130] sm:$0xff]  }
  0x7a   : > { %4081 = vmatpush3.bf16.msra.mxu1 %v4404_v63  ;;  %4042 = vmatprep.subr.bf16.mxu0 %v4407_v7  ;;  %v1499_v63 = vld [vmem:[%s4743_s5 + $0x10] sm:$0xf] }
  0x7b   : > { %4082 = vmatprep.subr.bf16.mxu1 %v4408_v10  ;;  %v4433_v36 = vld [vmem:[%s5439_s1 + $0x170] sm:$0xff]   ;;  %v3523_v3 = vcombine.low %v1498_v61, %v1499_v63  ;;  %v3560_v22 = vcombine.low %v1900_v14, %v1499_v63 }
  0x7c   : > { %v4449_v61 = vld [vmem:[%s5439_s1 + $0x1d0] sm:$0xff]  }
  0x7d   : > { %4043 = vmatpush3.bf16.msra.mxu0 %v4407_v7  ;;  %v4437_v7 = vld [vmem:[%s5439_s1 + $0x178] sm:$0xff]   ;;  %v1606_v12 = vshll.u32 %v3523_v3, 16  ;;  %v4455_v14 = vld [vmem:[%s4743_s5 + $0x4c] sm:$0xff]  }
  0x7e   : > { %4083 = vmatpush3.bf16.msra.mxu1 %v4408_v10  ;;  %4108 = vmatprep.subr.bf16.mxu0 %v4412_v15  ;;  %v999_v10 = vrot.slane %v4858_v57, 1 }
  0x7f   : > { %3981 = vmatmul.mubr.bf16.gmra.mrb[16].mxu0 %v577_v17  ;;  %4148 = vmatprep.subr.bf16.mxu1 %v4413_v16  ;;  %v1604_v17 = vshrl.u32 %v3523_v3, 16  ;;  %v1608_v20 = vrot.slane %v1606_v12, 1  ;;  %v4452_v3 = vld [vmem:[%s5439_s1 + $0x198] sm:$0xff]  }
  0x80   : > { %4021 = vmatmul.mubr.bf16.gmra.mrb[16].mxu1 %v4835_v41  ;;  %3984 = vmatprep.mubr.bf16.mxu0 %v585_v21  ;;  %v4430_v41 = vld [vmem:[%s4743_s5 + $0x4c] sm:$0xff]   ;;  %v1000_v18 = vsel %vm977_vm1, %v997_v9, %v999_v10  ;;  %v1611_v21 = vshll.u32 %v4439_v11, 16  ;;  %v1002_v31 = vsel %vm977_vm1, %v999_v10, %v1001_v24 }
  0x81   : > { %4024 = vmatprep.mubr.bf16.mxu1 %v4854_v55  ;;  %v998_v55 = vsel %vm977_vm1, %v995_v59, %v997_v9  ;;  %v1609_v26 = vor.u32 %v1608_v20, %v1604_v17  ;;  %v4456_v17 = vld [vmem:[%s5439_s1 + $0x1a0] sm:$0xff]  }
  0x82   : > { %v1613_v27 = vrot.slane %v1611_v21, 1  ;;  %v4457_v21 = vld [vmem:[%s5439_s1 + $0x1e0] sm:$0xff]  }
  0x87   : > { %3985 = vmatmul.mubr.bf16.gmra.mrb[20].mxu0 %v593_v28  ;;  %v4435_v28 = vld [vmem:[%s4743_s5 + $0x64] sm:$0xff]  }
  0x88   : > { %4025 = vmatmul.mubr.bf16.gmra.mrb[20].mxu1 %v4858_v57  ;;  %4044 = vmatprep.mubr.bf16.mxu0 %v980_v47  ;;  %v4434_v57 = vld [vmem:[%s4743_s5 + $0x5c] sm:$0xff]   ;;  %v1921_v47 = vrot.slane %v3560_v22, 1  ;;  %v1667_v22 = vshll.u32 %v4455_v14, 16 }
  0x89   : > { %4084 = vmatprep.mubr.bf16.mxu1 %v4410_v29  ;;  %v1922_v29 = vrot.slane %v4439_v11, 1 }
  0x8f   : > { %4045 = vmatmul.mubr.bf16.vlgmr.msra.gmra.mrb[24].mxu0 %v982_v32  ;;  %v1615_v32 = vshrl.u32 %v4439_v11, 16  ;;  %v4453_v11 = vld [vmem:[%s5439_s1 + $0x1d8] sm:$0xff]  }
  0x90   : > { %4085 = vmatmul.mubr.bf16.vlgmr.msra.gmra.mrb[24].mxu1 %v4411_v33  ;;  %4109 = vmatpush3.bf16.msra.mxu0 %v4412_v15  ;;  %v4442_v15 = vld [vmem:[%s5439_s1 + $0x180] sm:$0xff]   ;;  %v1619_v33 = vshll.u32 %v4441_v25, 16 }
  0x91   : > { %4149 = vmatpush3.bf16.msra.mxu1 %v4413_v16  ;;  %4110 = vmatprep.subr.bf16.mxu0 %v4414_v49  ;;  %v4443_v16 = vld [vmem:[%s5439_s1 + $0x1c0] sm:$0xff]  }
  0x92   : > { %4150 = vmatprep.subr.bf16.mxu1 %v4415_v34  ;;  %4048 = vmatprep.mubr.bf16.mxu0 %v984_v37  ;;  %v1617_v37 = vor.u32 %v1615_v32, %v1613_v27  ;;  %v1621_v50 = vrot.slane %v1619_v33, 1  ;;  %v4459_v32 = vld [vmem:[%s5439_s1 + $0x1e8] sm:$0xff]   ;;  %v4461_v33 = vld [vmem:[%s4743_s5 + $0x5c] sm:$0xff]  }
  0x93   : > { %4088 = vmatprep.mubr.bf16.mxu1 %v4416_v35  ;;  %v1627_v35 = vshll.u32 %v4446_v30, 16 }
  0x94   : > { %4111 = vmatpush3.bf16.msra.mxu0 %v4414_v49  ;;  %v1614_v49 = vsel %vm493_vm0, %v1609_v26, %v1613_v27 }
  0x95   : > { %4151 = vmatpush3.bf16.msra.mxu1 %v4415_v34  ;;  %4112 = vmatprep.subr.bf16.mxu0 %v4418_v62  ;;  %v1923_v34 = vsel %vm977_vm1, %v1921_v47, %v1922_v29 }
  0x96   : > { %4152 = vmatprep.subr.bf16.mxu1 %v4419_v38 }
  0x97   : > { %4049 = vmatmul.mubr.bf16.gmra.mrb[28].mxu0 %v986_v40  ;;  %v4444_v40 = vld [vmem:[%s5439_s1 + $0x188] sm:$0xff]  }
  0x98   : > { %4089 = vmatmul.mubr.bf16.gmra.mrb[28].mxu1 %v4417_v5  ;;  %4113 = vmatpush3.bf16.msra.mxu0 %v4418_v62  ;;  %v4447_v62 = vld [vmem:[%s4743_s5 + $0x2c] sm:$0xff]   ;;  %v1625_v5 = vor.u32 %v1623_v6, %v1621_v50 }
  0x99   : > { %4153 = vmatpush3.bf16.msra.mxu1 %v4419_v38  ;;  %4052 = vmatprep.mubr.bf16.mxu0 %v988_v42  ;;  %v1924_v38 = vrot.slane %v4441_v25, 1  ;;  %v1629_v42 = vrot.slane %v1627_v35, 1  ;;  %v1635_v45 = vshll.u32 %v4447_v62, 16  ;;  %v1928_v59 = vrot.slane %v4447_v62, 1 }
  0x9a   : > { %4092 = vmatprep.mubr.bf16.mxu1 %v4420_v43  ;;  %4114 = vmatprep.subr.bf16.mxu0 %v4422_v44  ;;  %v1926_v43 = vrot.slane %v4446_v30, 1 }
  0x9b   : > { %4154 = vmatprep.subr.bf16.mxu1 %v4423_v8  ;;  %v1925_v46 = vsel %vm977_vm1, %v1922_v29, %v1924_v38  ;;  %v1637_v56 = vrot.slane %v1635_v45, 1  ;;  %v1687_v45 = vshrl.u32 %v4461_v33, 16 }
  0x9c   : > { %4115 = vmatpush3.bf16.msra.mxu0 %v4422_v44  ;;  %v1622_v44 = vsel %vm493_vm0, %v1617_v37, %v1621_v50  ;;  %v5055_v37 = vld [vmem:[%s4743_s5 + $0x64] sm:$0xff]  }
  0x9d   : > { %4155 = vmatpush3.bf16.msra.mxu1 %v4423_v8  ;;  %4116 = vmatprep.subr.bf16.mxu0 %v4426_v48  ;;  %v1631_v8 = vshrl.u32 %v4446_v30, 16  ;;  %v4458_v30 = vld [vmem:[%s5439_s1 + $0x1a8] sm:$0xff]  }
  0x9e   : > { %4156 = vmatprep.subr.bf16.mxu1 %v4427_v51 }
  0x9f   : > { %4053 = vmatmul.mubr.bf16.gmra.mrb[32].mxu0 %v990_v52  ;;  %v1643_v52 = vshll.u32 %v4994_v39, 16 }
  0xa0   : > { %4093 = vmatmul.mubr.bf16.gmra.mrb[32].mxu1 %v4421_v53  ;;  %4056 = vmatprep.mubr.bf16.mxu0 %v992_v19  ;;  %v1630_v53 = vsel %vm493_vm0, %v1625_v5, %v1629_v42  ;;  %v4451_v19 = vld [vmem:[%s4743_s5 + $0x3c] sm:$0xff]  }
  0xa1   : > { %4096 = vmatprep.mubr.bf16.mxu1 %v4424_v23  ;;  %4117 = vmatpush3.bf16.msra.mxu0 %v4426_v48  ;;  %v4445_v48 = vld [vmem:[%s5439_s1 + $0x1c8] sm:$0xff]   ;;  %v1927_v23 = vsel %vm977_vm1, %v1924_v38, %v1926_v43  ;;  %v1683_v38 = vshll.u32 %v4461_v33, 16  ;;  %v5066_v5 = vld [vmem:[%s4743_s5 + $0x1c] sm:$0xf] }
  0xa2   : > { %4157 = vmatpush3.bf16.msra.mxu1 %v4427_v51  ;;  %4118 = vmatprep.subr.bf16.mxu0 %v4428_v54  ;;  %v1639_v51 = vshrl.u32 %v4447_v62, 16  ;;  %v4462_v62 = vld [vmem:[%s5439_s1 + $0x1b0] sm:$0xff]  }
  0xa3   : > { %4158 = vmatprep.subr.bf16.mxu1 %v4429_v58 }
  0xa4   : > { %v1641_v63 = vor.u32 %v1639_v51, %v1637_v56  ;;  %v4466_v51 = vld [vmem:[%s5439_s1 + $0x1b8] sm:$0xff]  }
  0xa5   : > { %4119 = vmatpush3.bf16.msra.mxu0 %v4428_v54  ;;  %v1633_v54 = vor.u32 %v1631_v8, %v1629_v42 }
  0xa6   : > { %4159 = vmatpush3.bf16.msra.mxu1 %v4429_v58  ;;  %4120 = vmatprep.subr.bf16.mxu0 %v4432_v60  ;;  %v4448_v58 = vld [vmem:[%s5439_s1 + $0x190] sm:$0xff]  }
  0xa7   : > { %4057 = vmatmul.mubr.bf16.gmra.mrb[36].mxu0 %v994_v0  ;;  %4160 = vmatprep.subr.bf16.mxu1 %v4433_v36  ;;  %v1930_v0 = vrot.slane %v4994_v39, 1 }
  0xa8   : > { %4097 = vmatmul.mubr.bf16.gmra.mrb[36].mxu1 %v4425_v1  ;;  %4060 = vmatprep.mubr.bf16.mxu0 %v996_v2  ;;  %v1651_v1 = vshll.u32 %v4451_v19, 16  ;;  %v1638_v2 = vsel %vm493_vm0, %v1633_v54, %v1637_v56  ;;  %v4465_v54 = vld [vmem:[%s4743_s5 + $0x6c] ss:$0 sps:$4 sm:$0x11]   ;;  %v1940_v56 = vrot.slane %v4461_v33, 1 }
  0xa9   : > { %4100 = vmatprep.mubr.bf16.mxu1 %v4430_v41  ;;  %4121 = vmatpush3.bf16.msra.mxu0 %v4432_v60  ;;  %v5012_v60 = vld [vmem:[%s4743_s5 + $0x44] sm:$0xff]   ;;  %v1647_v41 = vshrl.u32 %v4994_v39, 16  ;;  %v1931_v12 = vsel %vm977_vm1, %v1928_v59, %v1930_v0  ;;  %v4463_v39 = vld [vmem:[%s5439_s1 + $0x1f0] sm:$0xff]  }
  0xaa   : > { %4161 = vmatpush3.bf16.msra.mxu1 %v4433_v36  ;;  %4122 = vmatprep.subr.bf16.mxu0 %v4436_v4  ;;  %v1645_v36 = vrot.slane %v1643_v52, 1  ;;  %v1659_v9 = vshll.u32 %v5012_v60, 16  ;;  %v1934_v20 = vrot.slane %v5012_v60, 1  ;;  %v1663_v25 = vshrl.u32 %v5012_v60, 16  ;;  %v4474_v33 = vld [vmem:[%s5439_s1 + $0x208] sm:$0xff]  }
  0xab   : > { %4162 = vmatprep.subr.bf16.mxu1 %v4437_v7  ;;  %v1942_v60 = vrot.slane %v5055_v37, 1 }
  0xac   : > { %v1646_v10 = vsel %vm493_vm0, %v1641_v63, %v1645_v36 }
  0xad   : > { %4123 = vmatpush3.bf16.msra.mxu0 %v4436_v4  ;;  %v1929_v4 = vsel %vm977_vm1, %v1926_v43, %v1928_v59 }
  0xae   : > { %4163 = vmatpush3.bf16.msra.mxu1 %v4437_v7  ;;  %4188 = vmatprep.subr.bf16.mxu0 %v4442_v15  ;;  %v1655_v7 = vshrl.u32 %v4451_v19, 16 }
  0xaf   : > { %4061 = vmatmul.mubr.bf16.gmra.mrb[40].mxu0 %v998_v55  ;;  %4228 = vmatprep.subr.bf16.mxu1 %v4443_v16 }
  0xb0   : > { %4101 = vmatmul.mubr.bf16.gmra.mrb[40].mxu1 %v4431_v13  ;;  %4064 = vmatprep.mubr.bf16.mxu0 %v1000_v18  ;;  %v1653_v13 = vrot.slane %v1651_v1, 1  ;;  %v5035_v18 = vld [vmem:[%s4743_s5 + $0x54] sm:$0xff]   ;;  %v1695_v1 = vshrl.u32 %v5055_v37, 16 }
  0xb1   : > { %4104 = vmatprep.mubr.bf16.mxu1 %v4434_v57  ;;  %v1661_v57 = vrot.slane %v1659_v9, 1  ;;  %v1675_v47 = vshll.u32 %v5035_v18, 16  ;;  %v1938_v50 = vrot.slane %v5035_v18, 1  ;;  %v1679_v43 = vshrl.u32 %v5035_v18, 16 }
  0xb2   : > { %v1657_v55 = vor.u32 %v1655_v7, %v1653_v13 }
  0xb3   : > { %v1677_v35 = vrot.slane %v1675_v47, 1  ;;  %v4471_v47 = vld [vmem:[%s4743_s5 + $0x20] sm:$0xff]  }
  0xb4   : > { %v1662_v27 = vsel %vm493_vm0, %v1657_v55, %v1661_v57 }
  0xb7   : > { %4065 = vmatmul.mubr.bf16.gmra.mrb[44].mxu0 %v1002_v31  ;;  %v1669_v31 = vrot.slane %v1667_v22, 1 }
  0xb8   : > { %4105 = vmatmul.mubr.bf16.gmra.mrb[44].mxu1 %v4435_v28  ;;  %4124 = vmatprep.mubr.bf16.mxu0 %v1614_v49  ;;  %v1671_v28 = vshrl.u32 %v4455_v14, 16  ;;  %v1665_v49 = vor.u32 %v1663_v25, %v1661_v57  ;;  %v4468_v57 = vld [vmem:[%s4743_s5 + $0x18] sm:$0xff]  }
  0xb9   : > { %4164 = vmatprep.mubr.bf16.mxu1 %v1923_v34  ;;  %v1936_v34 = vrot.slane %v4455_v14, 1  ;;  %v5096_v14 = vld [vmem:[%s4743_s5 + $0x28] sm:$0xff]  }
  0xba   : > { %v1673_v6 = vor.u32 %v1671_v28, %v1669_v31  ;;  %v1670_v42 = vsel %vm493_vm0, %v1665_v49, %v1669_v31  ;;  %v5110_v28 = vld [vmem:[%s4743_s5 + $0x38] sm:$0xff]  }
  0xbc   : > { %v1678_v8 = vsel %vm493_vm0, %v1673_v6, %v1677_v35  ;;  %v4475_v6 = vld [vmem:[%s4743_s5 + $0x28] sm:$0xff]  }
  0xbf   : > { %4125 = vmatmul.mubr.bf16.vlgmr.msra.gmra.mrb[48].mxu0 %v1622_v44  ;;  %v1937_v44 = vsel %vm977_vm1, %v1934_v20, %v1936_v34 }
  0xc0   : > { %4165 = vmatmul.mubr.bf16.vlgmr.msra.gmra.mrb[48].mxu1 %v1925_v46  ;;  %4189 = vmatpush3.bf16.msra.mxu0 %v4442_v15  ;;  %v1649_v15 = vor.u32 %v1647_v41, %v1645_v36  ;;  %v1691_v46 = vshll.u32 %v5055_v37, 16  ;;  %v4473_v36 = vld [vmem:[%s5439_s1 + $0x200] sm:$0xff]   ;;  %v1941_v41 = vsel %vm977_vm1, %v1938_v50, %v1940_v56 }
  0xc1   : > { %4229 = vmatpush3.bf16.msra.mxu1 %v4443_v16  ;;  %4190 = vmatprep.subr.bf16.mxu0 %v4444_v40  ;;  %v1932_v16 = vrot.slane %v4451_v19, 1  ;;  %v4467_v19 = vld [vmem:[%s5439_s1 + $0x1f8] sm:$0xff]  }
  0xc2   : > { %4230 = vmatprep.subr.bf16.mxu1 %v4445_v48  ;;  %4128 = vmatprep.mubr.bf16.mxu0 %v1630_v53  ;;  %v1654_v24 = vsel %vm493_vm0, %v1649_v15, %v1653_v13  ;;  %v1685_v53 = vrot.slane %v1683_v38, 1  ;;  %v1693_v59 = vrot.slane %v1691_v46, 1  ;;  %v1944_v13 = vrot.slane %v4465_v54, 1 }
  0xc3   : > { %4168 = vmatprep.mubr.bf16.mxu1 %v1927_v23  ;;  %v1933_v26 = vsel %vm977_vm1, %v1930_v0, %v1932_v16  ;;  %v1935_v29 = vsel %vm977_vm1, %v1932_v16, %v1934_v20  ;;  %v1681_v23 = vor.u32 %v1679_v43, %v1677_v35  ;;  %v2582_v35 = vshrl.u32 %v5110_v28, 16  ;;  %v4477_v43 = vld [vmem:[%s4743_s5 + $0x30] sm:$0xff]  }
  0xc4   : > { %4191 = vmatpush3.bf16.msra.mxu0 %v4444_v40  ;;  %v2441_v40 = vld [vmem:[%s4743_s5 + $0x18] sm:$0xf]  ;;  %v1945_v18 = vsel %vm977_vm1, %v1942_v60, %v1944_v13 }
  0xc5   : > { %4231 = vmatpush3.bf16.msra.mxu1 %v4445_v48  ;;  %4192 = vmatprep.subr.bf16.mxu0 %v4448_v58  ;;  %v1939_v48 = vsel %vm977_vm1, %v1936_v34, %v1938_v50  ;;  %v3621_v52 = vcombine.low %v2441_v40, %v5066_v5  ;;  %v1686_v0 = vsel %vm493_vm0, %v1681_v23, %v1685_v53  ;;  %v2578_v34 = vshll.u32 %v5110_v28, 16  ;;  %v4479_v40 = vld [vmem:[%s5439_s1 + $0x210] sm:$0xff]  }
  0xc6   : > { %4232 = vmatprep.subr.bf16.mxu1 %v4449_v61 }
  0xc7   : > { %4129 = vmatmul.mubr.bf16.gmra.mrb[52].mxu0 %v1638_v2  ;;  %v2549_v63 = vshll.u32 %v3621_v52, 16  ;;  %v1699_v2 = vshll.u32 %v4465_v54, 16  ;;  %v2547_v7 = vshrl.u32 %v3621_v52, 16  ;;  %v4484_v52 = vld [vmem:[%s5439_s1 + $0x218] sm:$0xff]  }
  0xc8   : > { %4169 = vmatmul.mubr.bf16.gmra.mrb[52].mxu1 %v1929_v4  ;;  %4193 = vmatpush3.bf16.msra.mxu0 %v4448_v58  ;;  %v1689_v58 = vor.u32 %v1687_v45, %v1685_v53  ;;  %v1943_v4 = vsel %vm977_vm1, %v1940_v56, %v1942_v60  ;;  %v5147_v56 = vld [vmem:[%s4743_s5 + $0x58] sm:$0xff]  }
  0xc9   : > { %4233 = vmatpush3.bf16.msra.mxu1 %v4449_v61  ;;  %4132 = vmatprep.mubr.bf16.mxu0 %v1646_v10  ;;  %v5084_v61 = vld [vmem:[%s4743_s5 + $0x20] sm:$0xff]   ;;  %v2551_v9 = vrot.slane %v2549_v63, 1 }
  0xca   : > { %4172 = vmatprep.mubr.bf16.mxu1 %v1931_v12  ;;  %4194 = vmatprep.subr.bf16.mxu0 %v4452_v3  ;;  %v2554_v10 = vshll.u32 %v5084_v61, 16  ;;  %v1701_v12 = vrot.slane %v1699_v2, 1  ;;  %v2558_v20 = vshrl.u32 %v5084_v61, 16  ;;  %v2610_v2 = vshll.u32 %v5147_v56, 16 }
  0xcb   : > { %4234 = vmatprep.subr.bf16.mxu1 %v4453_v11  ;;  %v2552_v15 = vor.u32 %v2551_v9, %v2547_v7  ;;  %v4490_v7 = vld [vmem:[%s5439_s1 + $0x228] sm:$0xff]   ;;  %v2614_v9 = vshrl.u32 %v5147_v56, 16 }
  0xcc   : > { %4195 = vmatpush3.bf16.msra.mxu0 %v4452_v3  ;;  %v1694_v3 = vsel %vm493_vm0, %v1689_v58, %v1693_v59  ;;  %v2556_v16 = vrot.slane %v2554_v10, 1 }
  0xcd   : > { %4235 = vmatpush3.bf16.msra.mxu1 %v4453_v11  ;;  %4196 = vmatprep.subr.bf16.mxu0 %v4456_v17  ;;  %v1697_v11 = vor.u32 %v1695_v1, %v1693_v59  ;;  %v4489_v59 = vld [vmem:[%s5439_s1 + $0x220] sm:$0xff]   ;;  %v4485_v1 = vld [vmem:[%s4743_s5 + $0x48] sm:$0xff]  }
  0xce   : > { %4236 = vmatprep.subr.bf16.mxu1 %v4457_v21  ;;  %v2557_v22 = vsel %vm493_vm0, %v2552_v15, %v2556_v16 }
  0xcf   : > { %4133 = vmatmul.mubr.bf16.gmra.mrb[56].mxu0 %v1654_v24  ;;  %v1702_v55 = vsel %vm493_vm0, %v1697_v11, %v1701_v12  ;;  %v2566_v24 = vshrl.u32 %v5096_v14, 16  ;;  %v2612_v11 = vrot.slane %v2610_v2, 1  ;;  %v5167_v12 = vld [vmem:[%s4743_s5 + $0x68] sm:$0xff]  }
  0xd0   : > { %4173 = vmatmul.mubr.bf16.gmra.mrb[56].mxu1 %v1933_v26  ;;  %4136 = vmatprep.mubr.bf16.mxu0 %v1662_v27  ;;  %v2560_v26 = vor.u32 %v2558_v20, %v2556_v16  ;;  %v4491_v20 = vld [vmem:[%s4743_s5 + $0x58] sm:$0xff]  }
  0xd1   : > { %4176 = vmatprep.mubr.bf16.mxu1 %v1935_v29  ;;  %4197 = vmatpush3.bf16.msra.mxu0 %v4456_v17  ;;  %v5101_v17 = vld [vmem:[%s4743_s5 + $0x30] sm:$0xff]   ;;  %v5114_v29 = vld [vmem:[%s4743_s5 + $0x40] sm:$0xff]   ;;  %v2616_v15 = vor.u32 %v2614_v9, %v2612_v11 }
  0xd2   : > { %4237 = vmatpush3.bf16.msra.mxu1 %v4457_v21  ;;  %4198 = vmatprep.subr.bf16.mxu0 %v4458_v30  ;;  %v2562_v21 = vshll.u32 %v5096_v14, 16  ;;  %v2570_v25 = vshll.u32 %v5101_v17, 16  ;;  %v2574_v49 = vshrl.u32 %v5101_v17, 16  ;;  %v2586_v37 = vshll.u32 %v5114_v29, 16 }
  0xd3   : > { %4238 = vmatprep.subr.bf16.mxu1 %v4459_v32 }
  0xd4   : > { %v2564_v27 = vrot.slane %v2562_v21, 1  ;;  %v2572_v31 = vrot.slane %v2570_v25, 1  ;;  %v2626_v21 = vshll.u32 %v5167_v12, 16 }
  0xd5   : > { %4199 = vmatpush3.bf16.msra.mxu0 %v4458_v30 }
  0xd6   : > { %4239 = vmatpush3.bf16.msra.mxu1 %v4459_v32  ;;  %4200 = vmatprep.subr.bf16.mxu0 %v4462_v62  ;;  %v2568_v30 = vor.u32 %v2566_v24, %v2564_v27  ;;  %v2565_v32 = vsel %vm493_vm0, %v2560_v26, %v2564_v27  ;;  %v2576_v38 = vor.u32 %v2574_v49, %v2572_v31  ;;  %v2630_v26 = vshrl.u32 %v5167_v12, 16 }
  0xd7   : > { %4137 = vmatmul.mubr.bf16.gmra.mrb[60].mxu0 %v1670_v42  ;;  %4240 = vmatprep.subr.bf16.mxu1 %v4463_v39  ;;  %v5133_v42 = vld [vmem:[%s4743_s5 + $0x50] sm:$0xff]  }
  0xd8   : > { %4177 = vmatmul.mubr.bf16.gmra.mrb[60].mxu1 %v1937_v44  ;;  %4140 = vmatprep.mubr.bf16.mxu0 %v1678_v8  ;;  %v2573_v50 = vsel %vm493_vm0, %v2568_v30, %v2572_v31  ;;  %v2588_v8 = vrot.slane %v2586_v37, 1  ;;  %v2628_v30 = vrot.slane %v2626_v21, 1 }
  0xd9   : > { %4180 = vmatprep.mubr.bf16.mxu1 %v1939_v48  ;;  %4201 = vmatpush3.bf16.msra.mxu0 %v4462_v62  ;;  %v5127_v62 = vld [vmem:[%s4743_s5 + $0x48] sm:$0xff]   ;;  %v4480_v48 = vld [vmem:[%s4743_s5 + $0x38] sm:$0xff]  }
  0xda   : > { %4241 = vmatpush3.bf16.msra.mxu1 %v4463_v39  ;;  %4202 = vmatprep.subr.bf16.mxu0 %v4466_v51  ;;  %v2580_v39 = vrot.slane %v2578_v34, 1  ;;  %v2594_v45 = vshll.u32 %v5127_v62, 16  ;;  %v2598_v53 = vshrl.u32 %v5127_v62, 16  ;;  %v2843_v34 = vld [vmem:[%s4743_s5 + $0x18] sm:$0xe] }
  0xdb   : > { %4242 = vmatprep.subr.bf16.mxu1 %v4467_v19 }
  0xdc   : > { %v2584_v44 = vor.u32 %v2582_v35, %v2580_v39  ;;  %v2581_v46 = vsel %vm493_vm0, %v2576_v38, %v2580_v39  ;;  %v2596_v54 = vrot.slane %v2594_v45, 1  ;;  %v4496_v35 = vld [vmem:[%s4743_s5 + $0x68] sm:$0xff]   ;;  %v3658_v39 = vcombine.low %v2843_v34, %v5066_v5 }
  0xdd   : > { %4203 = vmatpush3.bf16.msra.mxu0 %v4466_v51  ;;  %v2590_v51 = vshrl.u32 %v5114_v29, 16  ;;  %v2865_v45 = vrot.slane %v5084_v61, 1  ;;  %v2869_v61 = vrot.slane %v5101_v17, 1  ;;  %v2873_v17 = vrot.slane %v5114_v29, 1 }
  0xde   : > { %4243 = vmatpush3.bf16.msra.mxu1 %v4467_v19  ;;  %4268 = vmatprep.subr.bf16.mxu0 %v4473_v36  ;;  %v2602_v19 = vshll.u32 %v5133_v42, 16  ;;  %v2589_v23 = vsel %vm493_vm0, %v2584_v44, %v2588_v8  ;;  %v2600_v60 = vor.u32 %v2598_v53, %v2596_v54 }
  0xdf   : > { %4141 = vmatmul.mubr.bf16.gmra.mrb[64].mxu0 %v1686_v0  ;;  %4308 = vmatprep.subr.bf16.mxu1 %v4473_v36  ;;  %v2592_v58 = vor.u32 %v2590_v51, %v2588_v8  ;;  %v4482_v0 = vld [vmem:[%s4743_s5 + $0x40] sm:$0xff]   ;;  %v2864_v8 = vrot.slane %v3658_v39, 1  ;;  %v4498_v51 = vld [vmem:[%s4743_s5 + $0x70] sm:$0xff]  }
  0xe0   : > { %4181 = vmatmul.mubr.bf16.gmra.mrb[64].mxu1 %v1941_v41  ;;  %4144 = vmatprep.mubr.bf16.mxu0 %v1694_v3  ;;  %v2604_v63 = vrot.slane %v2602_v19, 1  ;;  %v2606_v3 = vshrl.u32 %v5133_v42, 16  ;;  %v2867_v19 = vrot.slane %v5096_v14, 1  ;;  %v2871_v14 = vrot.slane %v5110_v28, 1 }
  0xe1   : > { %4184 = vmatprep.mubr.bf16.mxu1 %v1943_v4  ;;  %v2597_v41 = vsel %vm493_vm0, %v2592_v58, %v2596_v54  ;;  %v2866_v5 = vsel %vm977_vm1, %v2864_v8, %v2865_v45 }
  0xe2   : > { %v2605_v4 = vsel %vm493_vm0, %v2600_v60, %v2604_v63  ;;  %v2608_v13 = vor.u32 %v2606_v3, %v2604_v63  ;;  %v2870_v58 = vsel %vm977_vm1, %v2867_v19, %v2869_v61  ;;  %v2872_v63 = vsel %vm977_vm1, %v2869_v61, %v2871_v14 }
  0xe7   : > { %4145 = vmatmul.mubr.bf16.gmra.mrb[68].mxu0 %v1702_v55  ;;  %v4495_v55 = vld [vmem:[%s5439_s1 + $0x230] sm:$0xff]  }
  0xe8   : > { %4185 = vmatmul.mubr.bf16.gmra.mrb[68].mxu1 %v1945_v18  ;;  %4204 = vmatprep.mubr.bf16.mxu0 %v4468_v57  ;;  %v5173_v57 = vld [vmem:[%s4743_s5 + $0x70] sm:$0xff]  }
  0xe9   : > { %4244 = vmatprep.mubr.bf16.mxu1 %v2557_v22  ;;  %v4487_v18 = vld [vmem:[%s4743_s5 + $0x50] sm:$0xff]   ;;  %v2613_v22 = vsel %vm493_vm0, %v2608_v13, %v2612_v11  ;;  %v2634_v27 = vshll.u32 %v5173_v57, 16  ;;  %v2885_v60 = vrot.slane %v5173_v57, 1 }
  0xeb   : > { %v2636_v49 = vrot.slane %v2634_v27, 1 }
  0xef   : > { %4205 = vmatmul.mubr.bf16.vlgmr.msra.gmra.mrb[72].mxu0 %v4471_v47  ;;  %v4500_v47 = vld [vmem:[%s5439_s1 + $0x238] sm:$0xff]  }
  0xf0   : > { %4245 = vmatmul.mubr.bf16.vlgmr.msra.gmra.mrb[72].mxu1 %v2565_v32  ;;  %4269 = vmatpush3.bf16.msra.mxu0 %v4473_v36  ;;  %v4499_v32 = vld [vmem:[%s4743_s5 + $0x78] ss:$0 sps:$4 sm:$0x11]  }
  0xf1   : > { %4316 = vmatpush3.bf16.msra.mxu1 %v4473_v36  ;;  %4270 = vmatprep.subr.bf16.mxu0 %v4474_v33  ;;  %v5153_v36 = vld [vmem:[%s4743_s5 + $0x60] sm:$0xff]   ;;  %v2642_v38 = vshll.u32 %v4499_v32, 16  ;;  %v2887_v28 = vrot.slane %v4499_v32, 1 }
  0xf2   : > { %4309 = vmatprep.subr.bf16.mxu1 %v4474_v33  ;;  %4208 = vmatprep.mubr.bf16.mxu0 %v4475_v6  ;;  %v2618_v10 = vshll.u32 %v5153_v36, 16  ;;  %v2622_v24 = vshrl.u32 %v5153_v36, 16  ;;  %v4493_v6 = vld [vmem:[%s4743_s5 + $0x60] sm:$0xff]  }
  0xf3   : > { %4248 = vmatprep.mubr.bf16.mxu1 %v2573_v50  ;;  %v2638_v50 = vshrl.u32 %v5173_v57, 16  ;;  %v2644_v44 = vrot.slane %v2642_v38, 1 }
  0xf4   : > { %4271 = vmatpush3.bf16.msra.mxu0 %v4474_v33  ;;  %v2620_v16 = vrot.slane %v2618_v10, 1 }
  0xf5   : > { %4317 = vmatpush3.bf16.msra.mxu1 %v4474_v33  ;;  %4272 = vmatprep.subr.bf16.mxu0 %v4479_v40  ;;  %v2632_v33 = vor.u32 %v2630_v26, %v2628_v30 }
  0xf6   : > { %4310 = vmatprep.subr.bf16.mxu1 %v4479_v40  ;;  %v2621_v25 = vsel %vm493_vm0, %v2616_v15, %v2620_v16  ;;  %v2624_v31 = vor.u32 %v2622_v24, %v2620_v16 }
  0xf7   : > { %4209 = vmatmul.mubr.bf16.gmra.mrb[76].mxu0 %v4477_v43  ;;  %v2640_v43 = vor.u32 %v2638_v50, %v2636_v49 }
  0xf8   : > { %4249 = vmatmul.mubr.bf16.gmra.mrb[76].mxu1 %v2581_v46  ;;  %4273 = vmatpush3.bf16.msra.mxu0 %v4479_v40  ;;  %v2629_v37 = vsel %vm493_vm0, %v2624_v31, %v2628_v30  ;;  %v2875_v46 = vrot.slane %v5127_v62, 1  ;;  %v2881_v62 = vrot.slane %v5153_v36, 1 }
  0xf9   : > { %4318 = vmatpush3.bf16.msra.mxu1 %v4479_v40  ;;  %4212 = vmatprep.mubr.bf16.mxu0 %v4480_v48  ;;  %v2637_v40 = vsel %vm493_vm0, %v2632_v33, %v2636_v49  ;;  %v2877_v48 = vrot.slane %v5133_v42, 1  ;;  %v2868_v42 = vsel %vm977_vm1, %v2865_v45, %v2867_v19 }
  0xfa   : > { %4252 = vmatprep.mubr.bf16.mxu1 %v2589_v23  ;;  %4274 = vmatprep.subr.bf16.mxu0 %v4484_v52  ;;  %v2879_v23 = vrot.slane %v5147_v56, 1  ;;  %v2883_v56 = vrot.slane %v5167_v12, 1  ;;  %v2876_v2 = vsel %vm977_vm1, %v2873_v17, %v2875_v46 }
  0xfb   : > { %4311 = vmatprep.subr.bf16.mxu1 %v4484_v52  ;;  %v2878_v53 = vsel %vm977_vm1, %v2875_v46, %v2877_v48 }
  0xfc   : > { %4275 = vmatpush3.bf16.msra.mxu0 %v4484_v52  ;;  %v2880_v54 = vsel %vm977_vm1, %v2877_v48, %v2879_v23  ;;  %v2884_v36 = vsel %vm977_vm1, %v2881_v62, %v2883_v56 }
  0xfd   : > { %4319 = vmatpush3.bf16.msra.mxu1 %v4484_v52  ;;  %4276 = vmatprep.subr.bf16.mxu0 %v4489_v59  ;;  %v2645_v52 = vsel %vm493_vm0, %v2640_v43, %v2644_v44 }
  0xfe   : > { %4312 = vmatprep.subr.bf16.mxu1 %v4489_v59 }
  0xff   : > { %4213 = vmatmul.mubr.bf16.gmra.mrb[80].mxu0 %v4482_v0  ;;  %v2874_v0 = vsel %vm977_vm1, %v2871_v14, %v2873_v17 }
 0x100   : > { %4253 = vmatmul.mubr.bf16.gmra.mrb[80].mxu1 %v2597_v41  ;;  %4216 = vmatprep.mubr.bf16.mxu0 %v4485_v1  ;;  %v2886_v1 = vsel %vm977_vm1, %v2883_v56, %v2885_v60  ;;  %v2888_v41 = vsel %vm977_vm1, %v2885_v60, %v2887_v28 }
 0x101   : > { %4256 = vmatprep.mubr.bf16.mxu1 %v2605_v4  ;;  %4277 = vmatpush3.bf16.msra.mxu0 %v4489_v59 }
 0x102   : > { %4320 = vmatpush3.bf16.msra.mxu1 %v4489_v59  ;;  %4278 = vmatprep.subr.bf16.mxu0 %v4490_v7  ;;  %v2882_v59 = vsel %vm977_vm1, %v2879_v23, %v2881_v62 }
 0x103   : > { %4313 = vmatprep.subr.bf16.mxu1 %v4490_v7 }
 0x105   : > { %4279 = vmatpush3.bf16.msra.mxu0 %v4490_v7 }
 0x106   : > { %4321 = vmatpush3.bf16.msra.mxu1 %v4490_v7  ;;  %4280 = vmatprep.subr.bf16.mxu0 %v4495_v55 }
 0x107   : > { %4217 = vmatmul.mubr.bf16.gmra.mrb[84].mxu0 %v4487_v18  ;;  %4314 = vmatprep.subr.bf16.mxu1 %v4495_v55 }
 0x108   : > { %4257 = vmatmul.mubr.bf16.gmra.mrb[84].mxu1 %v2613_v22  ;;  %4220 = vmatprep.mubr.bf16.mxu0 %v4491_v20 }
 0x109   : > { %4260 = vmatprep.mubr.bf16.mxu1 %v2621_v25  ;;  %4281 = vmatpush3.bf16.msra.mxu0 %v4495_v55 }
 0x10a   : > { %4322 = vmatpush3.bf16.msra.mxu1 %v4495_v55  ;;  %4282 = vmatprep.subr.bf16.mxu0 %v4500_v47 }
 0x10b   : > { %4315 = vmatprep.subr.bf16.mxu1 %v4500_v47 }
 0x10d   : > { %4283 = vmatpush3.bf16.msra.mxu0 %v4500_v47 }
 0x10e   : > { %4323 = vmatpush3.bf16.msra.mxu1 %v4500_v47 }
 0x10f   : > { %4221 = vmatmul.mubr.bf16.gmra.mrb[88].mxu0 %v4493_v6 }
 0x110   : > { %4261 = vmatmul.mubr.bf16.gmra.mrb[88].mxu1 %v2629_v37  ;;  %4224 = vmatprep.mubr.bf16.mxu0 %v4496_v35 }
 0x111   : > { %4264 = vmatprep.mubr.bf16.mxu1 %v2637_v40 }
 0x117   : > { %4225 = vmatmul.mubr.bf16.gmra.mrb[92].mxu0 %v4498_v51 }
 0x118   : > { %4265 = vmatmul.mubr.bf16.gmra.mrb[92].mxu1 %v2645_v52  ;;  %4284 = vmatprep.mubr.bf16.mxu0 %v2866_v5 }
 0x119   : > { %4296 = vmatprep.mubr.bf16.mxu1 %v2878_v53 }
 0x11f   : > { %4285 = vmatmul.mubr.bf16.vlgmr.msra.gmra.mrb[96].mxu0 %v2868_v42 }
 0x120   : > { %4297 = vmatmul.mubr.bf16.vlgmr.msra.gmra.mrb[96].mxu1 %v2880_v54  ;;  %4288 = vmatprep.mubr.bf16.mxu0 %v2870_v58 }
 0x121   : > { %4300 = vmatprep.mubr.bf16.mxu1 %v2882_v59 }
 0x127   : > { %4289 = vmatmul.mubr.bf16.gmra.mrb[100].mxu0 %v2872_v63 }
 0x128   : > { %4301 = vmatmul.mubr.bf16.gmra.mrb[100].mxu1 %v2884_v36  ;;  %4292 = vmatprep.mubr.bf16.mxu0 %v2874_v0 }
 0x129   : > { %4304 = vmatprep.mubr.bf16.mxu1 %v2886_v1 }
 0x12f   : > { %4293 = vmatmul.mubr.bf16.gmra.mrb[104].mxu0 %v2876_v2 }
 0x130   : > { %4305 = vmatmul.mubr.bf16.gmra.mrb[104].mxu1 %v2888_v41 }
 0x132   : > { %v3966_v29 = vpop.f32.mrb[0].mxu0 }
 0x133   : > { %v4006_v3 = vpop.f32.mrb[0].mxu1  ;;  %v688_v4 = vpop.f32.mrb[1].mxu0 }
 0x134   : > { %v869_v7 = vpop.f32.mrb[1].mxu1  ;;  %v3967_v9 = vpop.f32.mrb[2].mxu0 }
 0x135   : > { %v870_v10 = vadd.f32 %v869_v7, %v688_v4  ;;  %v4007_v11 = vpop.f32.mrb[2].mxu1  ;;  %v691_v12 = vpop.f32.mrb[3].mxu0 }
 0x136   : > { %v880_v13 = vadd.f32 %v4007_v11, %v3967_v9  ;;  %v872_v15 = vpop.f32.mrb[3].mxu1 }
 0x137   : > { %v5219_v16 = vadd.f32 %v872_v15, %v691_v12 }
 0x13a   : > { %v3970_v55 = vpop.f32.mrb[4].mxu0 }
 0x13b   : > { %v4010_v57 = vpop.f32.mrb[4].mxu1  ;;  %v703_v18 = vpop.f32.mrb[5].mxu0 }
 0x13c   : > { %v5221_v20 = vadd.f32 %v4010_v57, %v3970_v55  ;;  %v884_v21 = vpop.f32.mrb[5].mxu1  ;;  %v3971_v22 = vpop.f32.mrb[6].mxu0 }
 0x13d   : > { %v5223_v24 = vadd.f32 %v884_v21, %v703_v18  ;;  %v4011_v25 = vpop.f32.mrb[6].mxu1  ;;  %v706_v26 = vpop.f32.mrb[7].mxu0 }
 0x13e   : > { %v5225_v27 = vadd.f32 %v4011_v25, %v3971_v22  ;;  %v887_v47 = vpop.f32.mrb[7].mxu1 }
 0x142   : > { %v3974_v30 = vpop.f32.mrb[8].mxu0 }
 0x143   : > { %v4014_v31 = vpop.f32.mrb[8].mxu1  ;;  %v718_v32 = vpop.f32.mrb[9].mxu0 }
 0x144   : > { %v5227_v33 = vadd.f32 %v4014_v31, %v3974_v30  ;;  %v899_v49 = vpop.f32.mrb[9].mxu1  ;;  %v3975_v34 = vpop.f32.mrb[10].mxu0 }
 0x145   : > { %v4015_v6 = vpop.f32.mrb[10].mxu1  ;;  %v720_v35 = vpop.f32.mrb[11].mxu0 }
 0x146   : > { %v901_v37 = vpop.f32.mrb[11].mxu1 }
 0x147   : > { %v5229_v50 = vadd.f32 %v901_v37, %v720_v35 }
 0x14a   : > { %v3978_v38 = vpop.f32.mrb[12].mxu0 }
 0x14b   : > { %v4018_v39 = vpop.f32.mrb[12].mxu1  ;;  %v732_v40 = vpop.f32.mrb[13].mxu0 }
 0x14c   : > { %v913_v43 = vpop.f32.mrb[13].mxu1  ;;  %v3979_v44 = vpop.f32.mrb[14].mxu0 }
 0x14d   : > { %v5231_v8 = vadd.f32 %v913_v43, %v732_v40  ;;  %v4019_v45 = vpop.f32.mrb[14].mxu1  ;;  %v735_v46 = vpop.f32.mrb[15].mxu0 }
 0x14e   : > { %v5233_v48 = vadd.f32 %v4019_v45, %v3979_v44  ;;  %v916_v51 = vpop.f32.mrb[15].mxu1 }
 0x14f   : > { %v5235_v52 = vadd.f32 %v916_v51, %v735_v46 }
 0x152   : > { %v3982_v5 = vpop.f32.mrb[16].mxu0 }
 0x153   : > { %v4022_v53 = vpop.f32.mrb[16].mxu1  ;;  %v747_v19 = vpop.f32.mrb[17].mxu0 }
 0x154   : > { %v5237_v23 = vadd.f32 %v4022_v53, %v3982_v5  ;;  %v928_v61 = vpop.f32.mrb[17].mxu1  ;;  %v3983_v62 = vpop.f32.mrb[18].mxu0 }
 0x155   : > { %v5239_v42 = vadd.f32 %v928_v61, %v747_v19  ;;  %v4023_v54 = vpop.f32.mrb[18].mxu1  ;;  %v750_v58 = vpop.f32.mrb[19].mxu0 }
 0x156   : > { %v5241_v59 = vadd.f32 %v4023_v54, %v3983_v62  ;;  %v931_v14 = vpop.f32.mrb[19].mxu1 }
 0x15a   : > { %v3986_v56 = vpop.f32.mrb[20].mxu0 }
 0x15b   : > { %v4026_v17 = vpop.f32.mrb[20].mxu1  ;;  %v762_v60 = vpop.f32.mrb[21].mxu0 }
 0x15c   : > { %v5243_v63 = vadd.f32 %v4026_v17, %v3986_v56  ;;  %v943_v36 = vpop.f32.mrb[21].mxu1  ;;  %v3987_v0 = vpop.f32.mrb[22].mxu0 }
 0x15d   : > { %v4027_v1 = vpop.f32.mrb[22].mxu1  ;;  %v764_v28 = vpop.f32.mrb[23].mxu0 }
 0x15e   : > { %v945_v2 = vpop.f32.mrb[23].mxu1 }
 0x15f   : > { %v5245_v41 = vadd.f32 %v945_v2, %v764_v28 }
 0x162   : > { %v4046_v29 = vpop.f32.mrb[24].mxu0 }
 0x163   : > { %v4086_v3 = vpop.f32.mrb[24].mxu1  ;;  %v1097_v4 = vpop.f32.mrb[25].mxu0 }
 0x164   : > { %v1184_v7 = vadd.f32 %v1097_v4, %v870_v10  ;;  %v1395_v9 = vpop.f32.mrb[25].mxu1  ;;  %v4047_v11 = vpop.f32.mrb[26].mxu0 }
 0x165   : > { %v1186_v12 = vadd.f32 %v4047_v11, %v880_v13  ;;  %v4087_v15 = vpop.f32.mrb[26].mxu1  ;;  %v1100_v55 = vpop.f32.mrb[27].mxu0 }
 0x166   : > { %v5247_v57 = vadd.f32 %v1395_v9, %v1184_v7  ;;  %v1185_v18 = vadd.f32 %v1100_v55, %v5219_v16  ;;  %v1398_v21 = vpop.f32.mrb[27].mxu1 }
 0x167   : > { %v5250_v22 = vadd.f32 %v4087_v15, %v1186_v12 }
 0x168   : > { %v5252_v25 = vadd.f32 %v1398_v21, %v1185_v18 }
 0x16a   : > { %v4050_v26 = vpop.f32.mrb[28].mxu0 }
 0x16b   : > { %v1188_v47 = vadd.f32 %v4050_v26, %v5221_v20  ;;  %v4090_v30 = vpop.f32.mrb[28].mxu1  ;;  %v1112_v31 = vpop.f32.mrb[29].mxu0 }
 0x16c   : > { %v1187_v10 = vadd.f32 %v1112_v31, %v5223_v24  ;;  %v1410_v32 = vpop.f32.mrb[29].mxu1  ;;  %v4051_v13 = vpop.f32.mrb[30].mxu0 }
 0x16d   : > { %v5256_v49 = vadd.f32 %v4090_v30, %v1188_v47  ;;  %v1189_v34 = vadd.f32 %v4051_v13, %v5225_v27  ;;  %v4091_v6 = vpop.f32.mrb[30].mxu1  ;;  %v1115_v16 = vpop.f32.mrb[31].mxu0 }
 0x16e   : > { %v5259_v35 = vadd.f32 %v1410_v32, %v1187_v10  ;;  %v1413_v37 = vpop.f32.mrb[31].mxu1 }
 0x16f   : > { %v5261_v38 = vadd.f32 %v4091_v6, %v1189_v34 }
 0x172   : > { %v4054_v39 = vpop.f32.mrb[32].mxu0 }
 0x173   : > { %v1191_v20 = vadd.f32 %v4054_v39, %v5227_v33  ;;  %v4094_v40 = vpop.f32.mrb[32].mxu1  ;;  %v1127_v43 = vpop.f32.mrb[33].mxu0 }
 0x174   : > { %v1425_v44 = vpop.f32.mrb[33].mxu1  ;;  %v4055_v24 = vpop.f32.mrb[34].mxu0 }
 0x175   : > { %v5264_v45 = vadd.f32 %v4094_v40, %v1191_v20  ;;  %v4095_v46 = vpop.f32.mrb[34].mxu1  ;;  %v1129_v51 = vpop.f32.mrb[35].mxu0 }
 0x176   : > { %v1190_v27 = vadd.f32 %v1129_v51, %v5229_v50  ;;  %v1427_v5 = vpop.f32.mrb[35].mxu1 }
 0x178   : > { %v5267_v53 = vadd.f32 %v1427_v5, %v1190_v27 }
 0x17a   : > { %v4058_v19 = vpop.f32.mrb[36].mxu0 }
 0x17b   : > { %v4098_v61 = vpop.f32.mrb[36].mxu1  ;;  %v1141_v62 = vpop.f32.mrb[37].mxu0 }
 0x17c   : > { %v1192_v54 = vadd.f32 %v1141_v62, %v5231_v8  ;;  %v1439_v58 = vpop.f32.mrb[37].mxu1  ;;  %v4059_v33 = vpop.f32.mrb[38].mxu0 }
 0x17d   : > { %v1194_v14 = vadd.f32 %v4059_v33, %v5233_v48  ;;  %v4099_v56 = vpop.f32.mrb[38].mxu1  ;;  %v1144_v17 = vpop.f32.mrb[39].mxu0 }
 0x17e   : > { %v5271_v60 = vadd.f32 %v1439_v58, %v1192_v54  ;;  %v1193_v36 = vadd.f32 %v1144_v17, %v5235_v52  ;;  %v1442_v0 = vpop.f32.mrb[39].mxu1 }
 0x17f   : > { %v5274_v50 = vadd.f32 %v4099_v56, %v1194_v14 }
 0x180   : > { %v5276_v1 = vadd.f32 %v1442_v0, %v1193_v36 }
 0x182   : > { %v4062_v28 = vpop.f32.mrb[40].mxu0 }
 0x183   : > { %v1196_v2 = vadd.f32 %v4062_v28, %v5237_v23  ;;  %v4102_v29 = vpop.f32.mrb[40].mxu1  ;;  %v1156_v8 = vpop.f32.mrb[41].mxu0 }
 0x184   : > { %v1195_v3 = vadd.f32 %v1156_v8, %v5239_v42  ;;  %v1454_v4 = vpop.f32.mrb[41].mxu1  ;;  %v4063_v48 = vpop.f32.mrb[42].mxu0 }
 0x185   : > { %v5280_v7 = vadd.f32 %v4102_v29, %v1196_v2  ;;  %v1197_v9 = vadd.f32 %v4063_v48, %v5241_v59  ;;  %v4103_v11 = vpop.f32.mrb[42].mxu1  ;;  %v1159_v52 = vpop.f32.mrb[43].mxu0 }
 0x186   : > { %v5283_v12 = vadd.f32 %v1454_v4, %v1195_v3  ;;  %v1457_v15 = vpop.f32.mrb[43].mxu1 }
 0x187   : > { %v5285_v55 = vadd.f32 %v4103_v11, %v1197_v9 }
 0x18a   : > { %v4066_v18 = vpop.f32.mrb[44].mxu0 }
 0x18b   : > { %v1199_v23 = vadd.f32 %v4066_v18, %v5243_v63  ;;  %v4106_v21 = vpop.f32.mrb[44].mxu1  ;;  %v1171_v26 = vpop.f32.mrb[45].mxu0 }
 0x18c   : > { %v1469_v47 = vpop.f32.mrb[45].mxu1  ;;  %v4067_v42 = vpop.f32.mrb[46].mxu0 }
 0x18d   : > { %v5288_v30 = vadd.f32 %v4106_v21, %v1199_v23  ;;  %v4107_v31 = vpop.f32.mrb[46].mxu1  ;;  %v1173_v10 = vpop.f32.mrb[47].mxu0 }
 0x18e   : > { %v1198_v59 = vadd.f32 %v1173_v10, %v5245_v41  ;;  %v1471_v32 = vpop.f32.mrb[47].mxu1 }
 0x190   : > { %v5291_v13 = vadd.f32 %v1471_v32, %v1198_v59 }
 0x192   : > { %v4126_v34 = vpop.f32.mrb[48].mxu0 }
 0x193   : > { %v4166_v6 = vpop.f32.mrb[48].mxu1  ;;  %v1797_v16 = vpop.f32.mrb[49].mxu0 }
 0x194   : > { %v1884_v37 = vadd.f32 %v1797_v16, %v5247_v57  ;;  %v2040_v39 = vpop.f32.mrb[49].mxu1  ;;  %v4127_v63 = vpop.f32.mrb[50].mxu0 }
 0x195   : > { %v1886_v20 = vadd.f32 %v4127_v63, %v5250_v22  ;;  %v4167_v40 = vpop.f32.mrb[50].mxu1  ;;  %v1800_v43 = vpop.f32.mrb[51].mxu0 }
 0x196   : > { %v5295_v44 = vadd.f32 %v2040_v39, %v1884_v37  ;;  %v1885_v24 = vadd.f32 %v1800_v43, %v5252_v25  ;;  %v2043_v46 = vpop.f32.mrb[51].mxu1 }
 0x197   : > { %v5298_v41 = vadd.f32 %v4167_v40, %v1886_v20 }
 0x198   : > { %v5300_v51 = vadd.f32 %v2043_v46, %v1885_v24 }
 0x19a   : > { %v4130_v27 = vpop.f32.mrb[52].mxu0 }
 0x19b   : > { %v1888_v5 = vadd.f32 %v4130_v27, %v5256_v49  ;;  %v4170_v19 = vpop.f32.mrb[52].mxu1  ;;  %v1812_v57 = vpop.f32.mrb[53].mxu0 }
 0x19c   : > { %v1887_v61 = vadd.f32 %v1812_v57, %v5259_v35  ;;  %v2055_v62 = vpop.f32.mrb[53].mxu1  ;;  %v4131_v22 = vpop.f32.mrb[54].mxu0 }
 0x19d   : > { %v5304_v54 = vadd.f32 %v4170_v19, %v1888_v5  ;;  %v1889_v58 = vadd.f32 %v4131_v22, %v5261_v38  ;;  %v4171_v33 = vpop.f32.mrb[54].mxu1  ;;  %v1815_v25 = vpop.f32.mrb[55].mxu0 }
 0x19e   : > { %v5307_v14 = vadd.f32 %v2055_v62, %v1887_v61  ;;  %v2058_v56 = vpop.f32.mrb[55].mxu1 }
 0x19f   : > { %v5309_v17 = vadd.f32 %v4171_v33, %v1889_v58 }
 0x1a2   : > { %v4134_v36 = vpop.f32.mrb[56].mxu0 }
 0x1a3   : > { %v1891_v49 = vadd.f32 %v4134_v36, %v5264_v45  ;;  %v4174_v0 = vpop.f32.mrb[56].mxu1  ;;  %v1827_v28 = vpop.f32.mrb[57].mxu0 }
 0x1a4   : > { %v2070_v2 = vpop.f32.mrb[57].mxu1  ;;  %v4135_v35 = vpop.f32.mrb[58].mxu0 }
 0x1a5   : > { %v5312_v29 = vadd.f32 %v4174_v0, %v1891_v49  ;;  %v4175_v8 = vpop.f32.mrb[58].mxu1  ;;  %v1829_v3 = vpop.f32.mrb[59].mxu0 }
 0x1a6   : > { %v1890_v38 = vadd.f32 %v1829_v3, %v5267_v53  ;;  %v2072_v4 = vpop.f32.mrb[59].mxu1 }
 0x1a8   : > { %v5315_v48 = vadd.f32 %v2072_v4, %v1890_v38 }
 0x1aa   : > { %v4138_v9 = vpop.f32.mrb[60].mxu0 }
 0x1ab   : > { %v4178_v11 = vpop.f32.mrb[60].mxu1  ;;  %v1841_v52 = vpop.f32.mrb[61].mxu0 }
 0x1ac   : > { %v1892_v15 = vadd.f32 %v1841_v52, %v5271_v60  ;;  %v2084_v18 = vpop.f32.mrb[61].mxu1  ;;  %v4139_v45 = vpop.f32.mrb[62].mxu0 }
 0x1ad   : > { %v1894_v23 = vadd.f32 %v4139_v45, %v5274_v50  ;;  %v4179_v21 = vpop.f32.mrb[62].mxu1  ;;  %v1844_v26 = vpop.f32.mrb[63].mxu0 }
 0x1ae   : > { %v5319_v47 = vadd.f32 %v2084_v18, %v1892_v15  ;;  %v1893_v42 = vadd.f32 %v1844_v26, %v5276_v1  ;;  %v2087_v31 = vpop.f32.mrb[63].mxu1 }
 0x1af   : > { %v5322_v53 = vadd.f32 %v4179_v21, %v1894_v23 }
 0x1b0   : > { %v5324_v10 = vadd.f32 %v2087_v31, %v1893_v42 }
 0x1b2   : > { %v4142_v59 = vpop.f32.mrb[64].mxu0 }
 0x1b3   : > { %v1896_v32 = vadd.f32 %v4142_v59, %v5280_v7  ;;  %v4182_v34 = vpop.f32.mrb[64].mxu1  ;;  %v1856_v60 = vpop.f32.mrb[65].mxu0 }
 0x1b4   : > { %v1895_v6 = vadd.f32 %v1856_v60, %v5283_v12  ;;  %v2099_v16 = vpop.f32.mrb[65].mxu1  ;;  %v4143_v50 = vpop.f32.mrb[66].mxu0 }
 0x1b5   : > { %v5328_v37 = vadd.f32 %v4182_v34, %v1896_v32  ;;  %v1897_v39 = vadd.f32 %v4143_v50, %v5285_v55  ;;  %v4183_v63 = vpop.f32.mrb[66].mxu1  ;;  %v1859_v1 = vpop.f32.mrb[67].mxu0 }
 0x1b6   : > { %v5331_v20 = vadd.f32 %v2099_v16, %v1895_v6  ;;  %v2102_v40 = vpop.f32.mrb[67].mxu1 }
 0x1b7   : > { %v5333_v43 = vadd.f32 %v4183_v63, %v1897_v39 }
 0x1ba   : > { %v4146_v24 = vpop.f32.mrb[68].mxu0 }
 0x1bb   : > { %v1899_v7 = vadd.f32 %v4146_v24, %v5288_v30  ;;  %v4186_v46 = vpop.f32.mrb[68].mxu1  ;;  %v1871_v27 = vpop.f32.mrb[69].mxu0 }
 0x1bc   : > { %v2114_v5 = vpop.f32.mrb[69].mxu1  ;;  %v4147_v12 = vpop.f32.mrb[70].mxu0 }
 0x1bd   : > { %v5336_v19 = vadd.f32 %v4186_v46, %v1899_v7  ;;  %v4187_v57 = vpop.f32.mrb[70].mxu1  ;;  %v1873_v61 = vpop.f32.mrb[71].mxu0 }
 0x1be   : > { %v1898_v55 = vadd.f32 %v1873_v61, %v5291_v13  ;;  %v2116_v62 = vpop.f32.mrb[71].mxu1 }
 0x1c0   : > { %v5339_v22 = vadd.f32 %v2116_v62, %v1898_v55 }
 0x1c2   : > { %v4206_v58 = vpop.f32.mrb[72].mxu0 }
 0x1c3   : > { %v4246_v33 = vpop.f32.mrb[72].mxu1  ;;  %v2338_v25 = vpop.f32.mrb[73].mxu0 }
 0x1c4   : > { %v2425_v56 = vadd.f32 %v2338_v25, %v5295_v44  ;;  %v2740_v36 = vpop.f32.mrb[73].mxu1  ;;  %v4207_v30 = vpop.f32.mrb[74].mxu0 }
 0x1c5   : > { %v2427_v49 = vadd.f32 %v4207_v30, %v5298_v41  ;;  %v4247_v0 = vpop.f32.mrb[74].mxu1  ;;  %v2341_v28 = vpop.f32.mrb[75].mxu0 }
 0x1c6   : > { %v5343_v2 = vadd.f32 %v2740_v36, %v2425_v56  ;;  %v2426_v35 = vadd.f32 %v2341_v28, %v5300_v51  ;;  %v2743_v8 = vpop.f32.mrb[75].mxu1 }
 0x1c7   : > { %v5346_v13 = vadd.f32 %v4247_v0, %v2427_v49 }
 0x1c8   : > { %v5348_v3 = vadd.f32 %v2743_v8, %v2426_v35 }
 0x1ca   : > { %v4210_v38 = vpop.f32.mrb[76].mxu0 }
 0x1cb   : > { %v2429_v4 = vadd.f32 %v4210_v38, %v5304_v54  ;;  %v4250_v9 = vpop.f32.mrb[76].mxu1  ;;  %v2353_v44 = vpop.f32.mrb[77].mxu0 }
 0x1cc   : > { %v2428_v11 = vadd.f32 %v2353_v44, %v5307_v14  ;;  %v2755_v52 = vpop.f32.mrb[77].mxu1  ;;  %v4211_v41 = vpop.f32.mrb[78].mxu0 }
 0x1cd   : > { %v5352_v15 = vadd.f32 %v4250_v9, %v2429_v4  ;;  %v2430_v18 = vadd.f32 %v4211_v41, %v5309_v17  ;;  %v4251_v45 = vpop.f32.mrb[78].mxu1  ;;  %v2356_v51 = vpop.f32.mrb[79].mxu0 }
 0x1ce   : > { %v5355_v23 = vadd.f32 %v2755_v52, %v2428_v11  ;;  %v2758_v21 = vpop.f32.mrb[79].mxu1  ;;  %v5382_v51 = vld [vmem:[%s5440_s2] ss:$0 sm:$0xff] }
 0x1cf   : > { %v5357_v26 = vadd.f32 %v4251_v45, %v2430_v18 }
 0x1d2   : > { %v4214_v42 = vpop.f32.mrb[80].mxu0 }
 0x1d3   : > { %v2432_v54 = vadd.f32 %v4214_v42, %v5312_v29  ;;  %v4254_v31 = vpop.f32.mrb[80].mxu1  ;;  %v2368_v59 = vpop.f32.mrb[81].mxu0 }
 0x1d4   : > { %v2770_v32 = vpop.f32.mrb[81].mxu1  ;;  %v4215_v14 = vpop.f32.mrb[82].mxu0 }
 0x1d5   : > { %v5360_v34 = vadd.f32 %v4254_v31, %v2432_v54  ;;  %v4255_v60 = vpop.f32.mrb[82].mxu1  ;;  %v2370_v6 = vpop.f32.mrb[83].mxu0 }
 0x1d6   : > { %v2431_v17 = vadd.f32 %v2370_v6, %v5315_v48  ;;  %v2772_v16 = vpop.f32.mrb[83].mxu1 }
 0x1d8   : > { %v5363_v50 = vadd.f32 %v2772_v16, %v2431_v17 }
 0x1da   : > { %v4218_v39 = vpop.f32.mrb[84].mxu0 }
 0x1db   : > { %v4258_v63 = vpop.f32.mrb[84].mxu1  ;;  %v2382_v1 = vpop.f32.mrb[85].mxu0 }
 0x1dc   : > { %v2433_v40 = vadd.f32 %v2382_v1, %v5319_v47  ;;  %v2784_v24 = vpop.f32.mrb[85].mxu1  ;;  %v4219_v29 = vpop.f32.mrb[86].mxu0 }
 0x1dd   : > { %v2435_v7 = vadd.f32 %v4219_v29, %v5322_v53  ;;  %v4259_v46 = vpop.f32.mrb[86].mxu1  ;;  %v2385_v27 = vpop.f32.mrb[87].mxu0 }
 0x1de   : > { %v2835_v5 = vadd.f32 %v2784_v24, %v2433_v40  ;;  %v2434_v12 = vadd.f32 %v2385_v27, %v5324_v10  ;;  %v2787_v57 = vpop.f32.mrb[87].mxu1 }
 0x1df   : > { %v2837_v61 = vadd.f32 %v4259_v46, %v2435_v7 }
 0x1e0   : > { %v2836_v48 = vadd.f32 %v2787_v57, %v2434_v12 }
 0x1e2   : > { %v4222_v55 = vpop.f32.mrb[88].mxu0 }
 0x1e3   : > { %v2437_v62 = vadd.f32 %v4222_v55, %v5328_v37  ;;  %v4262_v58 = vpop.f32.mrb[88].mxu1  ;;  %v2397_v33 = vpop.f32.mrb[89].mxu0 }
 0x1e4   : > { %v2436_v25 = vadd.f32 %v2397_v33, %v5331_v20  ;;  %v2799_v47 = vpop.f32.mrb[89].mxu1  ;;  %v4223_v56 = vpop.f32.mrb[90].mxu0 }
 0x1e5   : > { %v2839_v36 = vadd.f32 %v4262_v58, %v2437_v62  ;;  %v2438_v53 = vadd.f32 %v4223_v56, %v5333_v43  ;;  %v4263_v30 = vpop.f32.mrb[90].mxu1  ;;  %v2400_v49 = vpop.f32.mrb[91].mxu0 }
 0x1e6   : > { %v2838_v0 = vadd.f32 %v2799_v47, %v2436_v25  ;;  %v2802_v28 = vpop.f32.mrb[91].mxu1 }
 0x1e7   : > { %v5371_v10 = vadd.f32 %v4263_v30, %v2438_v53 }
 0x1ea   : > { %v4226_v35 = vpop.f32.mrb[92].mxu0 }
 0x1eb   : > { %v2440_v8 = vadd.f32 %v4226_v35, %v5336_v19  ;;  %v4266_v38 = vpop.f32.mrb[92].mxu1  ;;  %v2412_v37 = vpop.f32.mrb[93].mxu0 }
 0x1ec   : > { %v2814_v4 = vpop.f32.mrb[93].mxu1  ;;  %v4227_v9 = vpop.f32.mrb[94].mxu0 }
 0x1ed   : > { %v5374_v44 = vadd.f32 %v4266_v38, %v2440_v8  ;;  %v4267_v20 = vpop.f32.mrb[94].mxu1  ;;  %v2414_v11 = vpop.f32.mrb[95].mxu0 }
 0x1ee   : > { %v2439_v52 = vadd.f32 %v2414_v11, %v5339_v22  ;;  %v2816_v43 = vpop.f32.mrb[95].mxu1 }
 0x1f0   : > { %v5377_v41 = vadd.f32 %v2816_v43, %v2439_v52 }
 0x1f2   : > { %v4286_v18 = vpop.f32.mrb[96].mxu0 }
 0x1f3   : > { %v4298_v45 = vpop.f32.mrb[96].mxu1  ;;  %v2983_v19 = vpop.f32.mrb[97].mxu0 }
 0x1f4   : > { %v3070_v21 = vadd.f32 %v2983_v19, %v5343_v2  ;;  %v3027_v42 = vpop.f32.mrb[97].mxu1  ;;  %v4287_v54 = vpop.f32.mrb[98].mxu0 }
 0x1f5   : > { %v3078_v31 = vadd.f32 %v3027_v42, %v2835_v5  ;;  %v3072_v59 = vadd.f32 %v4287_v54, %v5346_v13  ;;  %v4299_v32 = vpop.f32.mrb[98].mxu1  ;;  %v2986_v22 = vpop.f32.mrb[99].mxu0 }
 0x1f6   : > { %v3092_v14 = vadd.f32 %v5382_v51, %v3070_v21  ;;  %v3080_v60 = vadd.f32 %v4299_v32, %v2837_v61  ;;  %v3071_v6 = vadd.f32 %v2986_v22, %v5348_v3  ;;  %v3030_v17 = vpop.f32.mrb[99].mxu1 }
 0x1f7   : > { %v3100_v16 = vadd.f32 %v5382_v51, %v3078_v31  ;;  %v3094_v39 = vadd.f32 %v5382_v51, %v3072_v59  ;;  %v3079_v63 = vadd.f32 %v3030_v17, %v2836_v48 }
 0x1f8   : > { %vm3108_vm2 = vcmp.ge.f32.partialorder %v3092_v14, 0.0  ;;  %v3124_v2 = vmul.f32 0.1, %v3092_v14  ;;  %v3102_v1 = vadd.f32 %v5382_v51, %v3080_v60  ;;  %v3093_v40 = vadd.f32 %v5382_v51, %v3071_v6 }
 0x1f9   : > { %vm3116_vm3 = vcmp.ge.f32.partialorder %v3100_v16, 0.0  ;;  %v3132_v13 = vmul.f32 0.1, %v3100_v16  ;;  %vm3110_vm4 = vcmp.ge.f32.partialorder %v3094_v39, 0.0  ;;  %v3126_v24 = vmul.f32 0.1, %v3094_v39 }
 0x1fa   : > { %vm3118_vm5 = vcmp.ge.f32.partialorder %v3102_v1, 0.0  ;;  %vm3109_vm6 = vcmp.ge.f32.partialorder %v3093_v40, 0.0  ;;  %v4290_v29 = vpop.f32.mrb[100].mxu0  ;;  %v3140_v3 = vsel %vm3108_vm2, %v3092_v14, %v3124_v2  ;;  %v3134_v7 = vmul.f32 0.1, %v3102_v1 }
 0x1fb   : > { %v3125_v46 = vmul.f32 0.1, %v3093_v40  ;;  %v3101_v27 = vadd.f32 %v5382_v51, %v3079_v63  ;;  %v4302_v5 = vpop.f32.mrb[100].mxu1  ;;  %v2998_v12 = vpop.f32.mrb[101].mxu0  ;;  %v3148_v57 = vsel %vm3116_vm3, %v3100_v16, %v3132_v13  ;;  %v3074_v61 = vadd.f32 %v4290_v29, %v5352_v15 }
 0x1fc   : > { %v3082_v48 = vadd.f32 %v4302_v5, %v2839_v36  ;;  %v3073_v55 = vadd.f32 %v2998_v12, %v5355_v23  ;;  %v3042_v62 = vpop.f32.mrb[101].mxu1  ;;  %v4291_v58 = vpop.f32.mrb[102].mxu0  ;;  %v3150_v37 = vsel %vm3118_vm5, %v3102_v1, %v3134_v7 }
 0x1fd   : > { %v3141_v33 = vsel %vm3109_vm6, %v3093_v40, %v3125_v46  ;;  %vm3117_vm7 = vcmp.ge.f32.partialorder %v3101_v27, 0.0  ;;  %v3133_v25 = vmul.f32 0.1, %v3101_v27  ;;  %v3081_v47 = vadd.f32 %v3042_v62, %v2838_v0  ;;  %v4303_v56 = vpop.f32.mrb[102].mxu1  ;;  %v3001_v53 = vpop.f32.mrb[103].mxu0 }
 0x1fe   : > { %v3724_v30 = vpack.c.bf16 %v3141_v33, %v3140_v3  ;;  %v3096_v49 = vadd.f32 %v5382_v51, %v3074_v61  ;;  %v3104_v28 = vadd.f32 %v5382_v51, %v3082_v48  ;;  %v3095_v15 = vadd.f32 %v5382_v51, %v3073_v55  ;;  %v3045_v36 = vpop.f32.mrb[103].mxu1 }
 0x1ff   : > { %v3149_v35 = vsel %vm3117_vm7, %v3101_v27, %v3133_v25  ;;  %v3103_v23 = vadd.f32 %v5382_v51, %v3081_v47  ;;  %v3075_v8 = vadd.f32 %v4291_v58, %v5357_v26  ;;  %v3083_v38 = vadd.f32 %v4303_v56, %v5371_v10 }
 0x200   : > { %v3142_v0 = vsel %vm3110_vm4, %v3094_v39, %v3126_v24  ;;  %3725 = vst [vmem:[%s4607_s4] sm:$0xff] %v3724_v30   ;;  %v3744_v4 = vpack.c.bf16 %v3149_v35, %v3148_v57  ;;  %vm3112_vm8 = vcmp.ge.f32.partialorder %v3096_v49, 0.0  ;;  %vm3111_vm9 = vcmp.ge.f32.partialorder %v3095_v15, 0.0 }
 0x201   : > { %v3127_v9 = vmul.f32 0.1, %v3095_v15  ;;  %vm3119_vm10 = vcmp.ge.f32.partialorder %v3103_v23, 0.0  ;;  %v3128_v20 = vmul.f32 0.1, %v3096_v49  ;;  %v3097_v52 = vadd.f32 %v5382_v51, %v3075_v8 }
 0x202   : > { %3764 = vst [vmem:[%s4607_s4 + $0x20] sm:$0xff] %v3744_v4   ;;  %v3135_v11 = vmul.f32 0.1, %v3103_v23  ;;  %v3105_v43 = vadd.f32 %v5382_v51, %v3083_v38  ;;  %v4294_v26 = vpop.f32.mrb[104].mxu0  ;;  %vm3120_vm11 = vcmp.ge.f32.partialorder %v3104_v28, 0.0 }
 0x203   : > { %v3136_v10 = vmul.f32 0.1, %v3104_v28  ;;  %v3143_v18 = vsel %vm3111_vm9, %v3095_v15, %v3127_v9  ;;  %v3077_v45 = vadd.f32 %v4294_v26, %v5360_v34  ;;  %v4306_v19 = vpop.f32.mrb[104].mxu1  ;;  %v3013_v21 = vpop.f32.mrb[105].mxu0  ;;  %vm3113_vm12 = vcmp.ge.f32.partialorder %v3097_v52, 0.0 }
 0x204   : > { %v3729_v42 = vpack.c.bf16 %v3143_v18, %v3142_v0  ;;  %v3151_v54 = vsel %vm3119_vm10, %v3103_v23, %v3135_v11  ;;  %v3129_v31 = vmul.f32 0.1, %v3097_v52  ;;  %v3057_v59 = vpop.f32.mrb[105].mxu1  ;;  %v4295_v32 = vpop.f32.mrb[106].mxu0  ;;  %vm3121_vm13 = vcmp.ge.f32.partialorder %v3105_v43, 0.0 }
 0x205   : > { %v3749_v22 = vpack.c.bf16 %v3151_v54, %v3150_v37  ;;  %v3137_v14 = vmul.f32 0.1, %v3105_v43  ;;  %v3099_v60 = vadd.f32 %v5382_v51, %v3077_v45  ;;  %v4307_v6 = vpop.f32.mrb[106].mxu1  ;;  %v3015_v17 = vpop.f32.mrb[107].mxu0  ;;  %v3144_v34 = vsel %vm3112_vm8, %v3096_v49, %v3128_v20 }
 0x206   : > { %3761 = vst [vmem:[%s4607_s4 + $0x8] sm:$0xff] %v3729_v42   ;;  %v3145_v16 = vsel %vm3113_vm12, %v3097_v52, %v3129_v31  ;;  %v3085_v39 = vadd.f32 %v4306_v19, %v5374_v44  ;;  %v3076_v63 = vadd.f32 %v3015_v17, %v5363_v50  ;;  %v3059_v2 = vpop.f32.mrb[107].mxu1  ;;  %v3152_v1 = vsel %vm3120_vm11, %v3104_v28, %v3136_v10 }
 0x207   : > { %3765 = vst [vmem:[%s4607_s4 + $0x28] sm:$0xff] %v3749_v22   ;;  %v3734_v40 = vpack.c.bf16 %v3145_v16, %v3144_v34  ;;  %v3153_v13 = vsel %vm3121_vm13, %v3105_v43, %v3137_v14  ;;  %v3131_v24 = vmul.f32 0.1, %v3099_v60  ;;  %v3084_v46 = vadd.f32 %v3059_v2, %v5377_v41 }
 0x208   : > { %v3754_v29 = vpack.c.bf16 %v3153_v13, %v3152_v1  ;;  %v3107_v3 = vadd.f32 %v5382_v51, %v3085_v39  ;;  %v3098_v7 = vadd.f32 %v5382_v51, %v3076_v63  ;;  %vm3115_vm14 = vcmp.ge.f32.partialorder %v3099_v60, 0.0 }
 0x209   : > { %3762 = vst [vmem:[%s4607_s4 + $0x10] sm:$0xff] %v3734_v40   ;;  %v3106_v27 = vadd.f32 %v5382_v51, %v3084_v46  ;;  %v3147_v5 = vsel %vm3115_vm14, %v3099_v60, %v3131_v24 }
 0x20a   : > { %3766 = vst [vmem:[%s4607_s4 + $0x30] sm:$0xff] %v3754_v29   ;;  %vm3114_vm15 = vcmp.ge.f32.partialorder %v3098_v7, 0.0  ;;  %v3130_v50 = vmul.f32 0.1, %v3098_v7  ;;  %v3139_v44 = vmul.f32 0.1, %v3107_v3 }
 0x20b   : > { %vm3123_vm0 = vcmp.ge.f32.partialorder %v3107_v3, 0.0  ;;  %vm3122_vm1 = vcmp.ge.f32.partialorder %v3106_v27, 0.0  ;;  %v3138_v61 = vmul.f32 0.1, %v3106_v27 }
 0x20c   : > { %v3146_v12 = vsel %vm3114_vm15, %v3098_v7, %v3130_v50  ;;  %v3155_v48 = vsel %vm3123_vm0, %v3107_v3, %v3139_v44 }
 0x20d   : > { %v3739_v57 = vpack.c.bf16 %v3147_v5, %v3146_v12  ;;  %v3154_v55 = vsel %vm3122_vm1, %v3106_v27, %v3138_v61 }
 0x20e   : > { %v3759_v62 = vpack.c.bf16 %v3155_v48, %v3154_v55 }
 0x20f   : > { %3763 = vst [vmem:[%s4607_s4 + $0x18] sm:$0xff] %v3739_v57  }
 0x210   : > { %3767 = vst [vmem:[%s4607_s4 + $0x38] sm:$0xff] %v3759_v62  }
 0x211 PF: > { %s13_s16 = sadd.s32 1, %s4542_s16   ;;  %s5442_s12 = smov %s4534_s14 }
 0x212   : > { %p10_p11 = scmp.ge.s32.totalorder %s13_s16, 6   ;;  %s5443_s13 = smov %s4538_s15 }
 0x213   : > { %s5444_s14 = smov %s5447_s17  ;;  %s5445_s15 = smov %s5451_s18 }
 0x214   :  { %12 = sbr.rel (!%p10_p11) target bundleno = 3 (0x3), region = 189 }
 0x21b   :  { %3275 = vsyncmov [#allocation3] }
 0x21e   :  { %s3276_s4 = vpop.sfrf %3275 }
 0x21f   :  { %p3700_p12 = scmp.ne.s32.totalorder %s3276_s4, 0 }
 0x221   :  { %3280 = shalt.err (%p3700_p12)  }
 0x222   :  { %3282 = vsyncmov [#allocation3 + $0x1] }
 0x225   :  { %s3283_s24 = vpop.sfrf %3282 }
 0x226   :  { %p3701_p13 = scmp.ne.s32.totalorder %s3283_s24, 0 }
 0x228   :  { %3287 = shalt.err (%p3701_p13)  }

</bundles_post_ra>
